<compile_context>
chip_gen: v7x
topology: tpu7x:2x2x1
jax: 0.10.0
libtpu: 0.0.40
codegen_flags: <defaults>
</compile_context>

<pallas_src>
import functools

import jax
import jax.numpy as jnp
from jax.experimental import pallas as pl
from jax.experimental.pallas import tpu as pltpu

NUM_HEADS = 2  # num_heads of the CrossAttention


def textctc_kernel(x_ref, wpool_ref, wq_ref, bq_ref, kbd_ref, vbd_ref,
                   cbias_ref, wo_ref, bo_ref,
                   logits_ref, cattn_ref, *, num_heads):
    f32 = jnp.float32
    TB, N, D = x_ref.shape
    H = num_heads
    NCP = cattn_ref.shape[1]            # lane-padded n_concepts (multiple of 128)

    x32 = x_ref[...].astype(f32)        # (TB, N, D); x may arrive as bf16

    # ---- token attention pooling: softmax(Linear(D->1)(x), dim=seq) --------
    # VPU multiply + lane reduce (no M=1 MXU passes); pooling bias dropped
    # because a constant added to every token cancels in the softmax.
    s = jnp.sum(x32 * wpool_ref[...], axis=-1, keepdims=True)          # (TB, N, 1)
    s = s - jnp.max(s, axis=1, keepdims=True)
    e = jnp.exp(s)
    tok = e * pl.reciprocal(jnp.sum(e, axis=1, keepdims=True), approx=True)
    xp = jnp.sum(tok * x32, axis=1)                                    # (TB, D) f32

    # ---- fused-head q projection: one (TB,D)@(D,D) MXU matmul --------------
    q = jnp.dot(xp.astype(wq_ref.dtype), wq_ref[...],
                preferred_element_type=f32) + bq_ref[...]              # (TB, D)

    # ---- fused-head attention scores via block-diagonal K ------------------
    attn = jnp.dot(q.astype(kbd_ref.dtype), kbd_ref[...],
                   preferred_element_type=f32)                         # (TB, H*NCP)

    cbias = cbias_ref[...]              # (1, NCP) f32, -1e30 on padded concepts
    vbd = vbd_ref[...]                  # (H*NCP, D), per-head 128-lane V slabs

    ctx = None
    csum = None
    for h in range(H):                  # static unroll; slices are 128-lane aligned
        a_h = attn[:, h * NCP:(h + 1) * NCP] + cbias
        a_h = a_h - jnp.max(a_h, axis=-1, keepdims=True)
        e_h = jnp.exp(a_h)
        a_h = e_h / jnp.sum(e_h, axis=-1, keepdims=True)   # exact recip (output-facing)
        csum = a_h if csum is None else csum + a_h
        c_h = jnp.dot(a_h.astype(vbd.dtype), vbd[h * NCP:(h + 1) * NCP, :],
                      preferred_element_type=f32)                      # (TB, D)
        ctx = c_h if ctx is None else ctx + c_h

    cattn_ref[...] = csum * (1.0 / H)                                  # (TB, NCP)

    # ---- fused-head output projection: one (TB,D)@(D,NCLP) matmul ----------
    logits_ref[...] = jnp.dot(ctx.astype(wo_ref.dtype), wo_ref[...],
                              preferred_element_type=f32) + bo_ref[...]


def _round_up(x, m):
    return ((x + m - 1) // m) * m


def _vmem_capacity_bytes():
    try:
        return int(pltpu.get_tpu_info().vmem_capacity_bytes)
    except Exception:
        return 64 << 20                 # conservative: v7x per-TensorCore VMEM


def _pick_block_b(B, N, D, itemsize, vmem_budget_bytes):
    """Default to the full batch (grid of 1: no per-step overhead on single-TC
    chips); otherwise the largest multiple of 8 dividing B whose x tile fits
    the per-buffer budget."""
    if B * N * D * itemsize <= vmem_budget_bytes:
        return B
    tb = max(8, vmem_budget_bytes // max(1, N * D * itemsize))
    tb = min(tb, B)
    tb -= tb % 8
    while tb >= 8 and B % tb:
        tb -= 8
    return tb if tb >= 8 else B


def textctc_forward(x, p, *, num_heads=NUM_HEADS, block_b=None,
                    compute_dtype=jnp.bfloat16):
    """x: (B, N, D) = proj(T5 last_hidden_state). Returns (logits, concept_attn)."""
    B, N, D = x.shape
    H = num_heads
    assert D % H == 0, "embedding_dim must be divisible by num_heads"
    hd = D // H
    scale = hd ** -0.5
    Nc = p["concepts"].shape[0]
    num_classes = p["wo"].shape[1]
    NCP = _round_up(Nc, 128)            # lane-dense concept axis
    NCLP = _round_up(num_classes, 128)  # lane-dense class axis
    f32 = jnp.float32
    cdt = jnp.dtype(compute_dtype)

    vmem_cap = _vmem_capacity_bytes()
    if block_b is None:
        # x is double-buffered; budget ~1/8 of VMEM per buffer.  On 2-TC chips
        # (v7x) callers may pass block_b = B // 2 so each core takes one tile.
        block_b = _pick_block_b(B, N, D, cdt.itemsize, vmem_cap // 8)
    assert B % block_b == 0 and (block_b == B or block_b % 8 == 0), \
        "batch tile must divide B and be a multiple of 8 (or the full batch)"
    grid = (B // block_b,)
    vmem_limit = min(max(32 << 20, (vmem_cap * 3) // 4), 96 << 20)

    # ---- hoisted, batch-independent weight prep (runs once per call) -------
    # 1/sqrt(hd) folded into wq AND bq (reference scales q@k^T where q already
    # includes the bias).
    wq_s = (p["wq"] * scale).astype(cdt)                               # (D, D)
    bq_s = (p["bq"] * scale).astype(f32)                               # (1, D)
    k = p["concepts"] @ p["wk"] + p["bk"]                              # (Nc, D)
    v = p["concepts"] @ p["wv"] + p["bv"]                              # (Nc, D)
    # Block-diagonal per-head K / V so all heads fuse into full-lane matmuls.
    kbd = jnp.zeros((D, H * NCP), f32)
    vbd = jnp.zeros((H * NCP, D), f32)
    for h in range(H):
        kbd = kbd.at[h * hd:(h + 1) * hd, h * NCP:h * NCP + Nc].set(
            k[:, h * hd:(h + 1) * hd].T)
        vbd = vbd.at[h * NCP:h * NCP + Nc, h * hd:(h + 1) * hd].set(
            v[:, h * hd:(h + 1) * hd])
    kbd = kbd.astype(cdt)
    vbd = vbd.astype(cdt)
    cbias = jnp.where(jnp.arange(NCP) < Nc, 0.0, -1e30).astype(f32).reshape(1, NCP)
    wo_p = jnp.zeros((D, NCLP), f32).at[:, :num_classes].set(p["wo"]).astype(cdt)
    bo_p = jnp.zeros((1, NCLP), f32).at[:, :num_classes].set(p["bo"])
    wpool = p["wpool"].astype(f32).reshape(1, 1, D)

    x_c = x.astype(cdt)                 # halve HBM bytes for the streamed input

    def _const(shape):
        n = len(shape)
        return pl.BlockSpec(shape, lambda b: (0,) * n)

    # TODO(synk): constant-weight inputs could use pipeline_mode=pl.Buffered(1)
    # for extra VMEM headroom on v7x if n_concepts / num_classes grow.
    logits_p, cattn_p = pl.pallas_call(
        functools.partial(textctc_kernel, num_heads=H),
        grid=grid,
        in_specs=[
            pl.BlockSpec((block_b, N, D), lambda b: (b, 0, 0)),  # x: streamed
            _const((1, 1, D)),                                   # pooling weight
            _const((D, D)), _const((1, D)),                      # q proj (scale folded)
            _const((D, H * NCP)), _const((H * NCP, D)),          # block-diag K / V
            _const((1, NCP)),                                    # concept padding bias
            _const((D, NCLP)), _const((1, NCLP)),                # out proj (lane padded)
        ],
        out_specs=(pl.BlockSpec((block_b, NCLP), lambda b: (b, 0)),
                   pl.BlockSpec((block_b, NCP), lambda b: (b, 0))),
        out_shape=(jax.ShapeDtypeStruct((B, NCLP), f32),
                   jax.ShapeDtypeStruct((B, NCP), f32)),
        compiler_params=pltpu.CompilerParams(
            dimension_semantics=("parallel",),   # batch tiles shard across TCs (v7x)
            vmem_limit_bytes=vmem_limit),
    )(x_c, wpool, wq_s, bq_s, kbd, vbd, cbias, wo_p, bo_p)

    return logits_p[:, :num_classes], cattn_p[:, :Nc]


def textctc_ref(x, p, num_heads=NUM_HEADS):
    """Pure-JAX reference mirroring the PyTorch forward (eval mode)."""
    B, N, D = x.shape
    H, hd = num_heads, D // num_heads
    scores = jnp.einsum("bnd,d->bn", x, p["wpool"][0]) + p["bpool"][0, 0]
    tok = jax.nn.softmax(scores, axis=1)
    xp = jnp.einsum("bn,bnd->bd", tok, x)
    q = xp @ p["wq"] + p["bq"]
    k = p["concepts"] @ p["wk"] + p["bk"]
    v = p["concepts"] @ p["wv"] + p["bv"]
    qh = q.reshape(B, H, hd)
    kh = k.reshape(-1, H, hd)
    vh = v.reshape(-1, H, hd)
    attn = jnp.einsum("bhd,chd->bhc", qh, kh) * hd ** -0.5
    attn = jax.nn.softmax(attn, axis=-1)
    ctx = jnp.einsum("bhc,chd->bhd", attn, vh).reshape(B, D)
    logits = ctx @ p["wo"] + p["bo"]
    return logits, attn.mean(axis=1)


def init_params(key, D, Nc, num_classes):
    ks = jax.random.split(key, 8)
    f32 = jnp.float32
    return {
        # token_attention_pool: Linear(D, 1) (weight kept in torch (1, D) layout)
        "wpool": (0.05 * jax.random.normal(ks[0], (1, D))).astype(f32),
        "bpool": jnp.zeros((1, 1), f32),
        # unsup_concepts: Parameter(1, Nc, D), init N(0, 0.02); leading 1 dropped
        "concepts": (0.02 * jax.random.normal(ks[1], (Nc, D))).astype(f32),
        # CrossAttention q/k/v: Linear(D, D) stored as (in, out)
        "wq": (0.05 * jax.random.normal(ks[2], (D, D))).astype(f32),
        "bq": jnp.zeros((1, D), f32),
        "wk": (0.05 * jax.random.normal(ks[3], (D, D))).astype(f32),
        "bk": jnp.zeros((1, D), f32),
        "wv": (0.05 * jax.random.normal(ks[4], (D, D))).astype(f32),
        "bv": jnp.zeros((1, D), f32),
        # CrossAttention out: Linear(D, num_classes), stored as (in, out)
        "wo": (0.05 * jax.random.normal(ks[5], (D, num_classes))).astype(f32),
        "bo": (0.01 * jax.random.normal(ks[6], (1, num_classes))).astype(f32),
    }


if __name__ == "__main__":
    B, N, D = 16, 16, 128        # batch, seq_len, embedding_dim (== t5 hidden size)
    Nc, num_classes = 10, 2      # n_unsup_concepts, num_classes

    key = jax.random.PRNGKey(0)
    kx, kp = jax.random.split(key)
    # x plays the role of proj(T5 last_hidden_state); proj is Identity here.
    x = jax.random.normal(kx, (B, N, D), dtype=jnp.float32)
    params = init_params(kp, D, Nc, num_classes)

    ref_logits, ref_cattn = textctc_ref(x, params)

    # Run both the single-tile (grid of 1) and batch-tiled (grid of 2) paths.
    for bb in (None, 8):
        fwd = jax.jit(functools.partial(textctc_forward, block_b=bb))
        logits, cattn = fwd(x, params)
        jax.block_until_ready((logits, cattn))
        assert logits.shape == (B, num_classes) and cattn.shape == (B, Nc)
        # Tolerance covers bf16 inputs/weights + the approx pooling reciprocal.
        assert jnp.allclose(logits, ref_logits, atol=5e-3, rtol=5e-2), \
            float(jnp.max(jnp.abs(logits - ref_logits)))
        assert jnp.allclose(cattn, ref_cattn, atol=5e-3, rtol=5e-2), \
            float(jnp.max(jnp.abs(cattn - ref_cattn)))

    print("KERNEL_OK")
</pallas_src>

<mosaic_0001>
module attributes {stable_mosaic.version = 11 : i64} {
  func.func @textctc_kernel(%arg0: i32, %arg1: memref<16x16x128xbf16, #tpu.memory_space<vmem>>, %arg2: memref<1x1x128xf32, #tpu.memory_space<vmem>>, %arg3: memref<128x128xbf16, #tpu.memory_space<vmem>>, %arg4: memref<1x128xf32, #tpu.memory_space<vmem>>, %arg5: memref<128x256xbf16, #tpu.memory_space<vmem>>, %arg6: memref<256x128xbf16, #tpu.memory_space<vmem>>, %arg7: memref<1x128xf32, #tpu.memory_space<vmem>>, %arg8: memref<128x128xbf16, #tpu.memory_space<vmem>>, %arg9: memref<1x128xf32, #tpu.memory_space<vmem>>, %arg10: memref<16x128xf32, #tpu.memory_space<vmem>>, %arg11: memref<16x128xf32, #tpu.memory_space<vmem>>) attributes {dimension_semantics = [#tpu.dimension_semantics<parallel>], iteration_bounds = array<i64: 1>, scalar_prefetch = 0 : i64, scratch_operands = 0 : i64, tpu.core_type = #tpu.core_type<tc>, window_params = [{transform_indices = @transform_0, window_bounds = array<i64: 16, 16, 128>}, {pipeline_mode = #tpu.pipeline_mode<synchronous>, transform_indices = @transform_1, window_bounds = array<i64: 1, 1, 128>}, {pipeline_mode = #tpu.pipeline_mode<synchronous>, transform_indices = @transform_2, window_bounds = array<i64: 128, 128>}, {pipeline_mode = #tpu.pipeline_mode<synchronous>, transform_indices = @transform_3, window_bounds = array<i64: 1, 128>}, {pipeline_mode = #tpu.pipeline_mode<synchronous>, transform_indices = @transform_4, window_bounds = array<i64: 128, 256>}, {pipeline_mode = #tpu.pipeline_mode<synchronous>, transform_indices = @transform_5, window_bounds = array<i64: 256, 128>}, {pipeline_mode = #tpu.pipeline_mode<synchronous>, transform_indices = @transform_6, window_bounds = array<i64: 1, 128>}, {pipeline_mode = #tpu.pipeline_mode<synchronous>, transform_indices = @transform_7, window_bounds = array<i64: 128, 128>}, {pipeline_mode = #tpu.pipeline_mode<synchronous>, transform_indices = @transform_8, window_bounds = array<i64: 1, 128>}, {transform_indices = @transform_9, window_bounds = array<i64: 16, 128>}, {transform_indices = @transform_10, window_bounds = array<i64: 16, 128>}]} {
    %c0 = arith.constant 0 : index
    %c0_0 = arith.constant 0 : index
    %c0_1 = arith.constant 0 : index
    %0 = vector.load %arg1[%c0, %c0_0, %c0_1] : memref<16x16x128xbf16, #tpu.memory_space<vmem>>, vector<16x16x128xbf16>
    %1 = arith.extf %0 : vector<16x16x128xbf16> to vector<16x16x128xf32>
    %c0_2 = arith.constant 0 : index
    %c0_3 = arith.constant 0 : index
    %c0_4 = arith.constant 0 : index
    %2 = vector.load %arg2[%c0_2, %c0_3, %c0_4] : memref<1x1x128xf32, #tpu.memory_space<vmem>>, vector<1x1x128xf32>
    %3 = vector.broadcast %2 : vector<1x1x128xf32> to vector<16x16x128xf32>
    %4 = arith.mulf %1, %3 : vector<16x16x128xf32>
    %cst = arith.constant dense<0.000000e+00> : vector<16x16xf32>
    %5 = vector.multi_reduction <add>, %4, %cst [2] : vector<16x16x128xf32> to vector<16x16xf32>
    %6 = vector.shape_cast %5 : vector<16x16xf32> to vector<16x16x1xf32>
    %cst_5 = arith.constant dense<0xFF800000> : vector<16x1xf32>
    %7 = vector.multi_reduction <maximumf>, %6, %cst_5 [1] : vector<16x16x1xf32> to vector<16x1xf32>
    %8 = vector.shape_cast %7 : vector<16x1xf32> to vector<16x1x1xf32>
    %9 = vector.broadcast %8 : vector<16x1x1xf32> to vector<16x16x1xf32>
    %10 = arith.subf %6, %9 : vector<16x16x1xf32>
    %11 = math.exp %10 : vector<16x16x1xf32>
    %cst_6 = arith.constant dense<0.000000e+00> : vector<16x1xf32>
    %12 = vector.multi_reduction <add>, %11, %cst_6 [1] : vector<16x16x1xf32> to vector<16x1xf32>
    %13 = vector.shape_cast %12 : vector<16x1xf32> to vector<16x1x1xf32>
    %14 = tpu.reciprocal %13 {approx = true} : vector<16x1x1xf32> -> vector<16x1x1xf32>
    %15 = vector.broadcast %14 : vector<16x1x1xf32> to vector<16x16x1xf32>
    %16 = arith.mulf %11, %15 : vector<16x16x1xf32>
    %17 = vector.broadcast %16 : vector<16x16x1xf32> to vector<16x16x128xf32>
    %18 = arith.mulf %17, %1 : vector<16x16x128xf32>
    %cst_7 = arith.constant dense<0.000000e+00> : vector<16x128xf32>
    %19 = vector.multi_reduction <add>, %18, %cst_7 [1] : vector<16x16x128xf32> to vector<16x128xf32>
    %20 = arith.truncf %19 : vector<16x128xf32> to vector<16x128xbf16>
    %c0_8 = arith.constant 0 : index
    %c0_9 = arith.constant 0 : index
    %21 = vector.load %arg3[%c0_8, %c0_9] : memref<128x128xbf16, #tpu.memory_space<vmem>>, vector<128x128xbf16>
    %cst_10 = arith.constant dense<0.000000e+00> : vector<16x128xf32>
    %22 = tpu.matmul %20, %21, %cst_10 {dimension_numbers = #tpu.dot_dimension_numbers<[1], [0], [0], [1], [0, 0, 1, 1], [], []>} : vector<16x128xbf16>, vector<128x128xbf16>, vector<16x128xf32> -> vector<16x128xf32>
    %c0_11 = arith.constant 0 : index
    %c0_12 = arith.constant 0 : index
    %23 = vector.load %arg4[%c0_11, %c0_12] : memref<1x128xf32, #tpu.memory_space<vmem>>, vector<1x128xf32>
    %24 = vector.broadcast %23 : vector<1x128xf32> to vector<16x128xf32>
    %25 = arith.addf %22, %24 : vector<16x128xf32>
    %26 = arith.truncf %25 : vector<16x128xf32> to vector<16x128xbf16>
    %c0_13 = arith.constant 0 : index
    %c0_14 = arith.constant 0 : index
    %27 = vector.load %arg5[%c0_13, %c0_14] : memref<128x256xbf16, #tpu.memory_space<vmem>>, vector<128x256xbf16>
    %cst_15 = arith.constant dense<0.000000e+00> : vector<16x256xf32>
    %28 = tpu.matmul %26, %27, %cst_15 {dimension_numbers = #tpu.dot_dimension_numbers<[1], [0], [0], [1], [0, 0, 1, 1], [], []>} : vector<16x128xbf16>, vector<128x256xbf16>, vector<16x256xf32> -> vector<16x256xf32>
    %c0_16 = arith.constant 0 : index
    %c0_17 = arith.constant 0 : index
    %29 = vector.load %arg7[%c0_16, %c0_17] : memref<1x128xf32, #tpu.memory_space<vmem>>, vector<1x128xf32>
    %c0_18 = arith.constant 0 : index
    %c0_19 = arith.constant 0 : index
    %30 = vector.load %arg6[%c0_18, %c0_19] : memref<256x128xbf16, #tpu.memory_space<vmem>>, vector<256x128xbf16>
    %31 = vector.extract_strided_slice %28 {offsets = [0, 0], sizes = [16, 128], strides = [1, 1]} : vector<16x256xf32> to vector<16x128xf32>
    %32 = vector.broadcast %29 : vector<1x128xf32> to vector<16x128xf32>
    %33 = arith.addf %31, %32 : vector<16x128xf32>
    %cst_20 = arith.constant dense<0xFF800000> : vector<16xf32>
    %34 = vector.multi_reduction <maximumf>, %33, %cst_20 [1] : vector<16x128xf32> to vector<16xf32>
    %35 = vector.shape_cast %34 : vector<16xf32> to vector<16x1xf32>
    %36 = vector.broadcast %35 : vector<16x1xf32> to vector<16x128xf32>
    %37 = arith.subf %33, %36 : vector<16x128xf32>
    %38 = math.exp %37 : vector<16x128xf32>
    %cst_21 = arith.constant dense<0.000000e+00> : vector<16xf32>
    %39 = vector.multi_reduction <add>, %38, %cst_21 [1] : vector<16x128xf32> to vector<16xf32>
    %40 = vector.shape_cast %39 : vector<16xf32> to vector<16x1xf32>
    %41 = vector.broadcast %40 : vector<16x1xf32> to vector<16x128xf32>
    %42 = arith.divf %38, %41 : vector<16x128xf32>
    %43 = arith.truncf %42 : vector<16x128xf32> to vector<16x128xbf16>
    %44 = vector.extract_strided_slice %30 {offsets = [0, 0], sizes = [128, 128], strides = [1, 1]} : vector<256x128xbf16> to vector<128x128xbf16>
    %cst_22 = arith.constant dense<0.000000e+00> : vector<16x128xf32>
    %45 = tpu.matmul %43, %44, %cst_22 {dimension_numbers = #tpu.dot_dimension_numbers<[1], [0], [0], [1], [0, 0, 1, 1], [], []>} : vector<16x128xbf16>, vector<128x128xbf16>, vector<16x128xf32> -> vector<16x128xf32>
    %46 = vector.extract_strided_slice %28 {offsets = [0, 128], sizes = [16, 128], strides = [1, 1]} : vector<16x256xf32> to vector<16x128xf32>
    %47 = vector.broadcast %29 : vector<1x128xf32> to vector<16x128xf32>
    %48 = arith.addf %46, %47 : vector<16x128xf32>
    %cst_23 = arith.constant dense<0xFF800000> : vector<16xf32>
    %49 = vector.multi_reduction <maximumf>, %48, %cst_23 [1] : vector<16x128xf32> to vector<16xf32>
    %50 = vector.shape_cast %49 : vector<16xf32> to vector<16x1xf32>
    %51 = vector.broadcast %50 : vector<16x1xf32> to vector<16x128xf32>
    %52 = arith.subf %48, %51 : vector<16x128xf32>
    %53 = math.exp %52 : vector<16x128xf32>
    %cst_24 = arith.constant dense<0.000000e+00> : vector<16xf32>
    %54 = vector.multi_reduction <add>, %53, %cst_24 [1] : vector<16x128xf32> to vector<16xf32>
    %55 = vector.shape_cast %54 : vector<16xf32> to vector<16x1xf32>
    %56 = vector.broadcast %55 : vector<16x1xf32> to vector<16x128xf32>
    %57 = arith.divf %53, %56 : vector<16x128xf32>
    %58 = arith.addf %42, %57 : vector<16x128xf32>
    %59 = arith.truncf %57 : vector<16x128xf32> to vector<16x128xbf16>
    %60 = vector.extract_strided_slice %30 {offsets = [128, 0], sizes = [128, 128], strides = [1, 1]} : vector<256x128xbf16> to vector<128x128xbf16>
    %cst_25 = arith.constant dense<0.000000e+00> : vector<16x128xf32>
    %61 = tpu.matmul %59, %60, %cst_25 {dimension_numbers = #tpu.dot_dimension_numbers<[1], [0], [0], [1], [0, 0, 1, 1], [], []>} : vector<16x128xbf16>, vector<128x128xbf16>, vector<16x128xf32> -> vector<16x128xf32>
    %62 = arith.addf %45, %61 : vector<16x128xf32>
    %cst_26 = arith.constant 5.000000e-01 : f32
    %63 = vector.broadcast %cst_26 : f32 to vector<16x128xf32>
    %64 = arith.mulf %58, %63 : vector<16x128xf32>
    %c0_27 = arith.constant 0 : index
    %c0_28 = arith.constant 0 : index
    %65 = vector.load %arg11[%c0_27, %c0_28] : memref<16x128xf32, #tpu.memory_space<vmem>>, vector<16x128xf32>
    tpu.vector_store %arg11[%c0_27, %c0_28], %64 {strides = array<i32>} : memref<16x128xf32, #tpu.memory_space<vmem>>, vector<16x128xf32>,
    %66 = arith.truncf %62 : vector<16x128xf32> to vector<16x128xbf16>
    %c0_29 = arith.constant 0 : index
    %c0_30 = arith.constant 0 : index
    %67 = vector.load %arg8[%c0_29, %c0_30] : memref<128x128xbf16, #tpu.memory_space<vmem>>, vector<128x128xbf16>
    %cst_31 = arith.constant dense<0.000000e+00> : vector<16x128xf32>
    %68 = tpu.matmul %66, %67, %cst_31 {dimension_numbers = #tpu.dot_dimension_numbers<[1], [0], [0], [1], [0, 0, 1, 1], [], []>} : vector<16x128xbf16>, vector<128x128xbf16>, vector<16x128xf32> -> vector<16x128xf32>
    %c0_32 = arith.constant 0 : index
    %c0_33 = arith.constant 0 : index
    %69 = vector.load %arg9[%c0_32, %c0_33] : memref<1x128xf32, #tpu.memory_space<vmem>>, vector<1x128xf32>
    %70 = vector.broadcast %69 : vector<1x128xf32> to vector<16x128xf32>
    %71 = arith.addf %68, %70 : vector<16x128xf32>
    %c0_34 = arith.constant 0 : index
    %c0_35 = arith.constant 0 : index
    %72 = vector.load %arg10[%c0_34, %c0_35] : memref<16x128xf32, #tpu.memory_space<vmem>>, vector<16x128xf32>
    tpu.vector_store %arg10[%c0_34, %c0_35], %71 {strides = array<i32>} : memref<16x128xf32, #tpu.memory_space<vmem>>, vector<16x128xf32>,
    return
  }
  func.func @transform_0(%arg0: i32) -> (i32, i32, i32) {
    %c0_i32 = arith.constant 0 : i32
    %c0_i32_0 = arith.constant 0 : i32
    %c0_i32_1 = arith.constant 0 : i32
    return %arg0, %c0_i32, %c0_i32_0 : i32, i32, i32
  }
  func.func @transform_1(%arg0: i32) -> (i32, i32, i32) {
    %c0_i32 = arith.constant 0 : i32
    %c0_i32_0 = arith.constant 0 : i32
    %c0_i32_1 = arith.constant 0 : i32
    %c0_i32_2 = arith.constant 0 : i32
    return %c0_i32, %c0_i32_0, %c0_i32_1 : i32, i32, i32
  }
  func.func @transform_2(%arg0: i32) -> (i32, i32) {
    %c0_i32 = arith.constant 0 : i32
    %c0_i32_0 = arith.constant 0 : i32
    %c0_i32_1 = arith.constant 0 : i32
    return %c0_i32, %c0_i32_0 : i32, i32
  }
  func.func @transform_3(%arg0: i32) -> (i32, i32) {
    %c0_i32 = arith.constant 0 : i32
    %c0_i32_0 = arith.constant 0 : i32
    %c0_i32_1 = arith.constant 0 : i32
    return %c0_i32, %c0_i32_0 : i32, i32
  }
  func.func @transform_4(%arg0: i32) -> (i32, i32) {
    %c0_i32 = arith.constant 0 : i32
    %c0_i32_0 = arith.constant 0 : i32
    %c0_i32_1 = arith.constant 0 : i32
    return %c0_i32, %c0_i32_0 : i32, i32
  }
  func.func @transform_5(%arg0: i32) -> (i32, i32) {
    %c0_i32 = arith.constant 0 : i32
    %c0_i32_0 = arith.constant 0 : i32
    %c0_i32_1 = arith.constant 0 : i32
    return %c0_i32, %c0_i32_0 : i32, i32
  }
  func.func @transform_6(%arg0: i32) -> (i32, i32) {
    %c0_i32 = arith.constant 0 : i32
    %c0_i32_0 = arith.constant 0 : i32
    %c0_i32_1 = arith.constant 0 : i32
    return %c0_i32, %c0_i32_0 : i32, i32
  }
  func.func @transform_7(%arg0: i32) -> (i32, i32) {
    %c0_i32 = arith.constant 0 : i32
    %c0_i32_0 = arith.constant 0 : i32
    %c0_i32_1 = arith.constant 0 : i32
    return %c0_i32, %c0_i32_0 : i32, i32
  }
  func.func @transform_8(%arg0: i32) -> (i32, i32) {
    %c0_i32 = arith.constant 0 : i32
    %c0_i32_0 = arith.constant 0 : i32
    %c0_i32_1 = arith.constant 0 : i32
    return %c0_i32, %c0_i32_0 : i32, i32
  }
  func.func @transform_9(%arg0: i32) -> (i32, i32) {
    %c0_i32 = arith.constant 0 : i32
    %c0_i32_0 = arith.constant 0 : i32
    return %arg0, %c0_i32 : i32, i32
  }
  func.func @transform_10(%arg0: i32) -> (i32, i32) {
    %c0_i32 = arith.constant 0 : i32
    %c0_i32_0 = arith.constant 0 : i32
    return %arg0, %c0_i32 : i32, i32
  }
}

</mosaic_0001>

<bundles_post_ra>
// kernel: textctc_forward.1
= control target key start
LH: loop header
LB: loop body
LE: loop exit
PB: predicated region body
PF: predicated region fallthrough
CT: control target
= control target key end

     0   :  { %s2726_s0 = inlined_call_operand.vmem [shape: bf16[16,16,128], index: 0, kind: input, shape index: {}]   ;;  %s2727_s1 = inlined_call_operand.vmem [shape: f32[1,1,128], index: 1, kind: input, shape index: {}]   ;;  %s2728_s2 = inlined_call_operand.vmem [shape: bf16[128,128], index: 2, kind: input, shape index: {}]   ;;  %s2729_s3 = inlined_call_operand.vmem [shape: f32[1,128], index: 3, kind: input, shape index: {}]   ;;  %s2730_s4 = inlined_call_operand.vmem [shape: bf16[128,256], index: 4, kind: input, shape index: {}]   ;;  %s2731_s5 = inlined_call_operand.vmem [shape: bf16[256,128], index: 5, kind: input, shape index: {}]   ;;  %s2732_s6 = inlined_call_operand.vmem [shape: f32[1,128], index: 6, kind: input, shape index: {}]   ;;  %s2733_s7 = inlined_call_operand.vmem [shape: bf16[128,128], index: 7, kind: input, shape index: {}]   ;;  %s2734_s8 = inlined_call_operand.vmem [shape: f32[1,128], index: 8, kind: input, shape index: {}]   ;;  %s2735_s9 = inlined_call_operand.vmem [shape: f32[16,128], index: 9, kind: output, shape index: {0}]   ;;  %s2736_s10 = inlined_call_operand.hbm [shape: f32[16,128], index: 10, kind: output, shape index: {1}]  }
   0x1   :  { %v1951_v0 = vld [vmem:[%s2726_s0 + $0x8] sm:$0xff]   ;;  %v1956_v1 = vld [vmem:[%s2727_s1] ss:$0 sm:$0xff]  ;;  %v1994_v15 = vld [vmem:[%s2726_s0 + $0x10] sm:$0xff]  }
   0x2   :  { %v1961_v2 = vld [vmem:[%s2726_s0] sm:$0xff]   ;;  %v1496_v3 = vunpack.c.l.bf16 %v1951_v0  ;;  %v2769_v5 = vunpack.c.h.bf16 %v1951_v0  ;;  %v1989_v14 = vld [vmem:[%s2726_s0 + $0x48] sm:$0xff]   ;;  %v2007_v20 = vld [vmem:[%s2726_s0 + $0x50] sm:$0xff]   ;;  %v2759_v23 = vunpack.c.h.bf16 %v1994_v15  ;;  %v2760_v24 = vunpack.c.l.bf16 %v1994_v15 }
   0x3   :  { %v2768_v4 = vunpack.c.l.bf16 %v1961_v2  ;;  %v2767_v6 = vunpack.c.h.bf16 %v1961_v2  ;;  %v1970_v7 = vld [vmem:[%s2726_s0 + $0x40] sm:$0xff]   ;;  %v2761_v18 = vunpack.c.h.bf16 %v1989_v14  ;;  %v2764_v19 = vunpack.c.l.bf16 %v1989_v14  ;;  %v2020_v25 = vld [vmem:[%s2726_s0 + $0x18] sm:$0xff]  }
   0x4   :  { %v109_v8 = vmul.f32 %v1496_v3, %v1956_v1  ;;  %v110_v10 = vmul.f32 %v2769_v5, %v1956_v1  ;;  %v2765_v12 = vunpack.c.h.bf16 %v1970_v7  ;;  %v2766_v13 = vunpack.c.l.bf16 %v1970_v7  ;;  %2791 = vst [vmem:[#allocation5_spill] sm:$0xff] %v2020_v25  ;;  %v2033_v30 = vld [vmem:[%s2726_s0 + $0x58] sm:$0xff]   ;;  %v2046_v35 = vld [vmem:[%s2726_s0 + $0x20] sm:$0xff]  }
   0x5   :  { %v107_v9 = vmul.f32 %v2768_v4, %v1956_v1  ;;  %v108_v11 = vmul.f32 %v2767_v6, %v1956_v1  ;;  %v126_v21 = vmul.f32 %v2761_v18, %v1956_v1  ;;  %v125_v22 = vmul.f32 %v2764_v19, %v1956_v1  ;;  %2792 = vst [vmem:[#allocation6_spill] sm:$0xff] %v2033_v30  ;;  %v2059_v40 = vld [vmem:[%s2726_s0 + $0x60] sm:$0xff]  }
   0x6   :  { %143 = vadd.xlane.f32.xlu1 %v109_v8  ;;  %v124_v16 = vmul.f32 %v2765_v12, %v1956_v1  ;;  %v123_v17 = vmul.f32 %v2766_v13, %v1956_v1  ;;  %v112_v26 = vmul.f32 %v2759_v23, %v1956_v1  ;;  %v111_v27 = vmul.f32 %v2760_v24, %v1956_v1 }
   0x7   :  { %139 = vadd.xlane.f32.xlu0 %v107_v9  ;;  %v2757_v28 = vunpack.c.h.bf16 %v2007_v20  ;;  %v2758_v29 = vunpack.c.l.bf16 %v2007_v20  ;;  %v2755_v33 = vunpack.c.h.bf16 %v2020_v25  ;;  %v2756_v34 = vunpack.c.l.bf16 %v2020_v25  ;;  %2793 = vst [vmem:[#allocation7_spill] sm:$0xff] %v2046_v35  ;;  %2794 = vst [vmem:[#allocation8_spill] sm:$0xff] %v2059_v40 }
   0x8   :  { %v2753_v38 = vunpack.c.h.bf16 %v2033_v30  ;;  %v2754_v39 = vunpack.c.l.bf16 %v2033_v30  ;;  %v2751_v43 = vunpack.c.h.bf16 %v2046_v35  ;;  %v2752_v44 = vunpack.c.l.bf16 %v2046_v35 }
   0x9   :  { %v128_v31 = vmul.f32 %v2757_v28, %v1956_v1  ;;  %v127_v32 = vmul.f32 %v2758_v29, %v1956_v1  ;;  %v114_v36 = vmul.f32 %v2755_v33, %v1956_v1  ;;  %v113_v37 = vmul.f32 %v2756_v34, %v1956_v1 }
   0xa   :  { %145 = vadd.xlane.f32.xlu1 %v110_v10  ;;  %v130_v41 = vmul.f32 %v2753_v38, %v1956_v1  ;;  %v129_v42 = vmul.f32 %v2754_v39, %v1956_v1 }
   0xb   :  { %141 = vadd.xlane.f32.xlu0 %v108_v11 }
   0xe   :  { %173 = vadd.xlane.f32.xlu1 %v124_v16 }
   0xf   :  { %171 = vadd.xlane.f32.xlu0 %v123_v17 }
  0x12   :  { %177 = vadd.xlane.f32.xlu1 %v126_v21 }
  0x13   :  { %175 = vadd.xlane.f32.xlu0 %v125_v22 }
  0x16   :  { %149 = vadd.xlane.f32.xlu1 %v112_v26 }
  0x17   :  { %147 = vadd.xlane.f32.xlu0 %v111_v27 }
  0x1a   :  { %181 = vadd.xlane.f32.xlu1 %v128_v31 }
  0x1b   :  { %179 = vadd.xlane.f32.xlu0 %v127_v32 }
  0x1e   :  { %153 = vadd.xlane.f32.xlu1 %v114_v36 }
  0x1f   :  { %151 = vadd.xlane.f32.xlu0 %v113_v37 }
  0x20   :  { %16 = vsyncpa [#allocation3], 0  ;;  %v116_v45 = vmul.f32 %v2751_v43, %v1956_v1  ;;  %v115_v46 = vmul.f32 %v2752_v44, %v1956_v1  ;;  %v2749_v47 = vunpack.c.h.bf16 %v2059_v40  ;;  %v2750_v48 = vunpack.c.l.bf16 %v2059_v40  ;;  %v2080_v49 = vld [vmem:[%s2726_s0 + $0x28] sm:$0xff]   ;;  %v2106_v59 = vld [vmem:[%s2726_s0 + $0x30] sm:$0xff]   ;;  %s1890_s26 = smov [#allocation2]  }
  0x21   :  { %2795 = vst [vmem:[#allocation9_spill] sm:$0xff] %v2080_v49  ;;  %v2747_v52 = vunpack.c.h.bf16 %v2080_v49  ;;  %v2748_v53 = vunpack.c.l.bf16 %v2080_v49  ;;  %v2093_v54 = vld [vmem:[%s2726_s0 + $0x68] sm:$0xff]   ;;  %2797 = vst [vmem:[#allocation11_spill] sm:$0xff] %v2106_v59  ;;  %v2743_v62 = vunpack.c.h.bf16 %v2106_v59  ;;  %v2744_v63 = vunpack.c.l.bf16 %v2106_v59  ;;  %v2119_v8 = vld [vmem:[%s2726_s0 + $0x70] sm:$0xff]   ;;  %s1425_s27 = sshll.u32 %s1890_s26, 4  ;;  %s1426_s27 = int_to_ptr.vmem [resolvable:$true] %s1425_s27 }
  0x22   :  { %185 = vadd.xlane.f32.xlu1 %v130_v41  ;;  %v132_v50 = vmul.f32 %v2749_v47, %v1956_v1  ;;  %v131_v51 = vmul.f32 %v2750_v48, %v1956_v1  ;;  %2796 = vst [vmem:[#allocation10_spill] sm:$0xff] %v2093_v54  ;;  %v2745_v57 = vunpack.c.h.bf16 %v2093_v54  ;;  %v2746_v58 = vunpack.c.l.bf16 %v2093_v54  ;;  %2798 = vst [vmem:[#allocation12_spill] sm:$0xff] %v2119_v8  ;;  %v2132_v17 = vld [vmem:[%s2726_s0 + $0x38] sm:$0xff]   ;;  %p1868_p1 = scmp.lt.s32.totalorder %s1426_s27, %s1426_s27 }
  0x23   :  { %183 = vadd.xlane.f32.xlu0 %v129_v42  ;;  %v118_v55 = vmul.f32 %v2747_v52, %v1956_v1  ;;  %v117_v56 = vmul.f32 %v2748_v53, %v1956_v1  ;;  %v120_v9 = vmul.f32 %v2743_v62, %v1956_v1  ;;  %v119_v10 = vmul.f32 %v2744_v63, %v1956_v1  ;;  %v2145_v31 = vld [vmem:[%s2726_s0 + $0x78] sm:$0xff]  }
  0x24   :  { %v134_v60 = vmul.f32 %v2745_v57, %v1956_v1  ;;  %v133_v61 = vmul.f32 %v2746_v58, %v1956_v1  ;;  %v2740_v11 = vunpack.c.h.bf16 %v2119_v8  ;;  %v2742_v16 = vunpack.c.l.bf16 %v2119_v8  ;;  %2799 = vst [vmem:[#allocation13_spill] sm:$0xff] %v2132_v17  ;;  %2800 = vst [vmem:[#allocation14_spill] sm:$0xff] %v2145_v31 }
  0x25   :  { %v2738_v26 = vunpack.c.h.bf16 %v2132_v17  ;;  %v2739_v27 = vunpack.c.l.bf16 %v2132_v17  ;;  %v2737_v37 = vunpack.c.h.bf16 %v2145_v31  ;;  %v2741_v41 = vunpack.c.l.bf16 %v2145_v31 }
  0x26   :  { %157 = vadd.xlane.f32.xlu1 %v116_v45  ;;  %v136_v21 = vmul.f32 %v2740_v11, %v1956_v1  ;;  %v135_v22 = vmul.f32 %v2742_v16, %v1956_v1  ;;  %vm1888_vm0 = vmmov 0   ;;  %vm786_vm1 = vcmask 1041409  }
  0x27   :  { %155 = vadd.xlane.f32.xlu0 %v115_v46  ;;  %v122_v32 = vmul.f32 %v2738_v26, %v1956_v1  ;;  %v121_v36 = vmul.f32 %v2739_v27, %v1956_v1  ;;  %v138_v42 = vmul.f32 %v2737_v37, %v1956_v1  ;;  %v137_v45 = vmul.f32 %v2741_v41, %v1956_v1 }
  0x28   :  { %vm788_vm2 = vcmask 1042434   ;;  %vm790_vm3 = vcmask 1043459   ;;  %vm792_vm4 = vcmask 1044484   ;;  %vm794_vm5 = vcmask 1045509  }
  0x29   :  { %vm796_vm6 = vcmask 1046534   ;;  %vm798_vm7 = vcmask 1047559  }
  0x2a   :  { %189 = vadd.xlane.f32.xlu1 %v132_v50 }
  0x2b   :  { %187 = vadd.xlane.f32.xlu0 %v131_v51 }
  0x2e   :  { %161 = vadd.xlane.f32.xlu1 %v118_v55 }
  0x2f   :  { %159 = vadd.xlane.f32.xlu0 %v117_v56 }
  0x32   :  { %193 = vadd.xlane.f32.xlu1 %v134_v60 }
  0x33   :  { %191 = vadd.xlane.f32.xlu0 %v133_v61 }
  0x36   :  { %165 = vadd.xlane.f32.xlu1 %v120_v9 }
  0x37   :  { %163 = vadd.xlane.f32.xlu0 %v119_v10 }
  0x3a   :  { %197 = vadd.xlane.f32.xlu1 %v136_v21 }
  0x3b   :  { %195 = vadd.xlane.f32.xlu0 %v135_v22 }
  0x3e   :  { %169 = vadd.xlane.f32.xlu1 %v122_v32 }
  0x3f   :  { %167 = vadd.xlane.f32.xlu0 %v121_v36 }
  0x42   :  { %201 = vadd.xlane.f32.xlu1 %v138_v42 }
  0x43   :  { %199 = vadd.xlane.f32.xlu0 %v137_v45 }
  0x93   :  { %v144_v46 = vpop.xlane.xlu1 %143 }
  0x94   :  { %v140_v50 = vpop.xlane.xlu0 %139 }
  0x97   :  { %v146_v51 = vpop.xlane.xlu1 %145 }
  0x98   :  { %v142_v55 = vpop.xlane.xlu0 %141  ;;  %v210_v56 = vmax.f32 %v144_v46, %v146_v51 }
  0x99   :  { %v203_v60 = vmax.f32 %v140_v50, %v142_v55 }
  0x9a   :  { %v211_v61 = vrot.slane %v210_v56, 4 }
  0x9b   :  { %v204_v9 = vrot.slane %v203_v60, 4  ;;  %v174_v10 = vpop.xlane.xlu1 %173 }
  0x9c   :  { %v172_v21 = vpop.xlane.xlu0 %171  ;;  %v212_v22 = vmax.f32 %v210_v56, %v211_v61 }
  0x9d   :  { %v205_v32 = vmax.f32 %v203_v60, %v204_v9  ;;  %v259_v36 = vmax.f32 %v172_v21, %v174_v10 }
  0x9e   :  { %v213_v37 = vrot.slane %v212_v22, 2 }
  0x9f   :  { %v206_v26 = vrot.slane %v205_v32, 2  ;;  %v260_v27 = vrot.slane %v259_v36, 4  ;;  %v2161_v11 = vpop.xlane.xlu1 %177 }
  0xa0   :  { %v2163_v1 = vpop.xlane.xlu0 %175  ;;  %v214_v42 = vmax.f32 %v212_v22, %v213_v37 }
  0xa1   :  { %v207_v45 = vmax.f32 %v205_v32, %v206_v26  ;;  %v261_v41 = vmax.f32 %v259_v36, %v260_v27  ;;  %v266_v16 = vmax.f32 %v2163_v1, %v2161_v11 }
  0xa2   :  { %v215_v62 = vrot.slane %v214_v42, 1 }
  0xa3   :  { %v208_v63 = vrot.slane %v207_v45, 1  ;;  %v262_v57 = vrot.slane %v261_v41, 2  ;;  %v267_v58 = vrot.slane %v266_v16, 4  ;;  %v2167_v56 = vpop.xlane.xlu1 %149 }
  0xa4   :  { %v2169_v60 = vpop.xlane.xlu0 %147  ;;  %v216_v61 = vmax.f32 %v214_v42, %v215_v62 }
  0xa5   :  { %v209_v9 = vmax.f32 %v207_v45, %v208_v63  ;;  %v263_v52 = vmax.f32 %v261_v41, %v262_v57  ;;  %v268_v53 = vmax.f32 %v266_v16, %v267_v58  ;;  %v217_v37 = vmax.f32 %v2169_v60, %v2167_v56 }
  0xa6   :  { %v317_v26 = vsub.f32 %v144_v46, %v216_v61  ;;  %v318_v27 = vsub.f32 %v146_v51, %v216_v61  ;;  %v1695_v46 = vld [vmem:[%s2728_s2] sm:$0xff]  }
  0xa7   :  { %v315_v22 = vsub.f32 %v140_v50, %v209_v9  ;;  %v316_v32 = vsub.f32 %v142_v55, %v209_v9  ;;  %v264_v36 = vrot.slane %v263_v52, 1  ;;  %v269_v47 = vrot.slane %v268_v53, 2  ;;  %v2173_v43 = vpop.xlane.xlu1 %181 }
  0xa8   :  { %v218_v48 = vrot.slane %v217_v37, 4  ;;  %v2175_v44 = vpop.xlane.xlu0 %179  ;;  %v351_v38 = vmul.f32 1.442695, %v317_v26  ;;  %v353_v39 = vmul.f32 1.442695, %v318_v27  ;;  %v2762_v9 = vmov 0.0  }
  0xa9   :  { %v347_v62 = vmul.f32 1.442695, %v315_v22  ;;  %v273_v57 = vmax.f32 %v2175_v44, %v2173_v43  ;;  %v349_v58 = vmul.f32 1.442695, %v316_v32  ;;  %v265_v63 = vmax.f32 %v263_v52, %v264_v36  ;;  %1605 = vmatprep.subr.bf16.mxu0 %v2762_v9  ;;  %1621 = vmatprep.mubr.msk.bf16.mxu0 %vm1888_vm0, %v2762_v9 }
  0xaa   :  { %v270_v16 = vmax.f32 %v268_v53, %v269_v47  ;;  %v219_v41 = vmax.f32 %v217_v37, %v218_v48  ;;  %1751 = vpow2.f32 %v351_v38  ;;  %1606 = vmatpush3.bf16.msra.mxu0 %v1695_v46  ;;  %v1696_v38 = vld [vmem:[%s2728_s2 + $0x8] sm:$0xff]  }
  0xab   :  { %v274_v50 = vrot.slane %v273_v57, 4  ;;  %1753 = vpow2.f32 %v353_v39  ;;  %v331_v51 = vsub.f32 %v172_v21, %v265_v63  ;;  %v332_v55 = vsub.f32 %v174_v10, %v265_v63  ;;  %v2182_v45 = vpop.xlane.xlu1 %153  ;;  %1607 = vmatprep.subr.bf16.mxu0 %v2762_v9 }
  0xac   :  { %v271_v42 = vrot.slane %v270_v16, 1  ;;  %v2184_v61 = vpop.xlane.xlu0 %151  ;;  %1755 = vpow2.f32 %v347_v62  ;;  %v220_v47 = vrot.slane %v219_v41, 2 }
  0xad   :  { %v275_v48 = vmax.f32 %v273_v57, %v274_v50  ;;  %v224_v52 = vmax.f32 %v2184_v61, %v2182_v45  ;;  %1757 = vpow2.f32 %v349_v58  ;;  %v379_v39 = vmul.f32 1.442695, %v331_v51  ;;  %v1697_v57 = vld [vmem:[%s2728_s2 + $0x10] sm:$0xff]  }
  0xae   :  { %v381_v53 = vmul.f32 1.442695, %v332_v55  ;;  %v272_v10 = vmax.f32 %v270_v16, %v271_v42  ;;  %v221_v21 = vmax.f32 %v219_v41, %v220_v47  ;;  %1608 = vmatpush3.bf16.msra.mxu0 %v1696_v38  ;;  %v1698_v47 = vld [vmem:[%s2728_s2 + $0x18] sm:$0xff]  }
  0xaf   :  { %v276_v37 = vrot.slane %v275_v48, 2  ;;  %v225_v26 = vrot.slane %v224_v52, 4  ;;  %1759 = vpow2.f32 %v379_v39  ;;  %v2193_v27 = vpop.xlane.xlu1 %185  ;;  %1609 = vmatprep.subr.bf16.mxu0 %v2762_v9 }
  0xb0   :  { %v2195_v22 = vpop.xlane.xlu0 %183  ;;  %1761 = vpow2.f32 %v381_v53  ;;  %v333_v32 = vsub.f32 %v2163_v1, %v272_v10  ;;  %v222_v36 = vrot.slane %v221_v21, 1  ;;  %v334_v58 = vsub.f32 %v2161_v11, %v272_v10 }
  0xb1   :  { %v277_v62 = vmax.f32 %v275_v48, %v276_v37  ;;  %v226_v63 = vmax.f32 %v224_v52, %v225_v26  ;;  %v280_v16 = vmax.f32 %v2195_v22, %v2193_v27 }
  0xb2   :  { %v223_v41 = vmax.f32 %v221_v21, %v222_v36  ;;  %v383_v55 = vmul.f32 1.442695, %v333_v32  ;;  %1610 = vmatpush3.bf16.msra.mxu0 %v1697_v57  ;;  %v385_v52 = vmul.f32 1.442695, %v334_v58  ;;  %v1699_v57 = vld [vmem:[%s2728_s2 + $0x20] sm:$0xff]  }
  0xb3   :  { %v278_v46 = vrot.slane %v277_v62, 1  ;;  %v2205_v50 = vpop.xlane.xlu1 %157  ;;  %v227_v39 = vrot.slane %v226_v63, 2  ;;  %v281_v53 = vrot.slane %v280_v16, 4  ;;  %1611 = vmatprep.subr.bf16.mxu0 %v2762_v9 }
  0xb4   :  { %v2207_v1 = vpop.xlane.xlu0 %155  ;;  %v2211_v51 = vpop.eup %1751  ;;  %v319_v11 = vsub.f32 %v2169_v60, %v223_v41  ;;  %v320_v38 = vsub.f32 %v2167_v56, %v223_v41  ;;  %1763 = vpow2.f32 %v383_v55 }
  0xb5   :  { %v279_v42 = vmax.f32 %v277_v62, %v278_v46  ;;  %v2217_v48 = vpop.eup %1753  ;;  %v231_v37 = vmax.f32 %v2207_v1, %v2205_v50  ;;  %1765 = vpow2.f32 %v385_v52  ;;  %v228_v41 = vmax.f32 %v226_v63, %v227_v39  ;;  %v1700_v63 = vld [vmem:[%s2728_s2 + $0x28] sm:$0xff]  }
  0xb6   :  { %v2221_v10 = vpop.eup %1755  ;;  %v418_v60 = vadd.f32 %v2217_v48, %v2211_v51  ;;  %v355_v62 = vmul.f32 1.442695, %v319_v11  ;;  %1612 = vmatpush3.bf16.msra.mxu0 %v1698_v47  ;;  %v282_v46 = vmax.f32 %v280_v16, %v281_v53 }
  0xb7   :  { %v335_v21 = vsub.f32 %v2175_v44, %v279_v42  ;;  %v2228_v26 = vpop.eup %1757  ;;  %v336_v32 = vsub.f32 %v2173_v43, %v279_v42  ;;  %v357_v44 = vmul.f32 1.442695, %v320_v38  ;;  %1613 = vmatprep.subr.bf16.mxu0 %v2762_v9  ;;  %v232_v55 = vrot.slane %v231_v37, 4  ;;  %v2241_v11 = vpop.xlane.xlu1 %189 }
  0xb8   :  { %v419_v36 = vrot.slane %v418_v60, 4  ;;  %v411_v56 = vadd.f32 %v2228_v26, %v2221_v10  ;;  %v2243_v47 = vpop.xlane.xlu0 %187  ;;  %1767 = vpow2.f32 %v355_v62  ;;  %v229_v16 = vrot.slane %v228_v41, 1 }
  0xb9   :  { %v2236_v58 = vpop.eup %1759  ;;  %v387_v34 = vmul.f32 1.442695, %v335_v21  ;;  %v389_v29 = vmul.f32 1.442695, %v336_v32  ;;  %1769 = vpow2.f32 %v357_v44  ;;  %v283_v39 = vrot.slane %v282_v46, 2 }
  0xba   :  { %v2239_v43 = vpop.eup %1761  ;;  %v420_v42 = vadd.f32 %v419_v36, %v418_v60  ;;  %v412_v33 = vrot.slane %v411_v56, 4  ;;  %1614 = vmatpush3.bf16.msra.mxu0 %v1699_v57  ;;  %v287_v53 = vmax.f32 %v2243_v47, %v2241_v11  ;;  %v233_v32 = vmax.f32 %v231_v37, %v232_v55  ;;  %v1701_v57 = vld [vmem:[%s2728_s2 + $0x30] sm:$0xff]  }
  0xbb   :  { %v467_v28 = vadd.f32 %v2239_v43, %v2236_v58  ;;  %1615 = vmatprep.subr.bf16.mxu0 %v2762_v9  ;;  %1771 = vpow2.f32 %v387_v34  ;;  %v230_v44 = vmax.f32 %v228_v41, %v229_v16  ;;  %v284_v23 = vmax.f32 %v282_v46, %v283_v39  ;;  %v1702_v41 = vld [vmem:[%s2728_s2 + $0x38] sm:$0xff]  }
  0xbc   :  { %v421_v52 = vrot.slane %v420_v42, 2  ;;  %v413_v38 = vadd.f32 %v412_v33, %v411_v56  ;;  %1773 = vpow2.f32 %v389_v29  ;;  %v288_v33 = vrot.slane %v287_v53, 4 }
  0xbd   :  { %v468_v36 = vrot.slane %v467_v28, 4  ;;  %v234_v34 = vrot.slane %v233_v32, 2  ;;  %v321_v46 = vsub.f32 %v2184_v61, %v230_v44  ;;  %v322_v39 = vsub.f32 %v2182_v45, %v230_v44  ;;  %v1703_v45 = vld [vmem:[%s2730_s4 + $0x4] ss:$8 sps:$4 sm:$0xff]  }
  0xbe   :  { %v422_v60 = vadd.f32 %v421_v52, %v420_v42  ;;  %v414_v21 = vrot.slane %v413_v38, 2  ;;  %1616 = vmatpush3.bf16.msra.mxu0 %v1700_v63  ;;  %v2257_v24 = vpop.eup %1763  ;;  %v289_v37 = vmax.f32 %v287_v53, %v288_v33  ;;  %v285_v53 = vrot.slane %v284_v23, 1  ;;  %995 = vmatprep.subr.bf16.mxu1 %v1703_v45 }
  0xbf   :  { %1617 = vmatprep.subr.bf16.mxu0 %v2762_v9  ;;  %v2259_v55 = vpop.eup %1765  ;;  %v469_v29 = vadd.f32 %v468_v36, %v467_v28  ;;  %v361_v44 = vmul.f32 1.442695, %v322_v39 }
  0xc0   :  { %v423_v56 = vrot.slane %v422_v60, 1  ;;  %v415_v62 = vadd.f32 %v414_v21, %v413_v38  ;;  %v290_v63 = vrot.slane %v289_v37, 2  ;;  %v474_v36 = vadd.f32 %v2259_v55, %v2257_v24 }
  0xc1   :  { %v470_v21 = vrot.slane %v469_v29, 2 }
  0xc2   :  { %v424_v42 = vadd.f32 %v423_v56, %v422_v60  ;;  %v416_v52 = vrot.slane %v415_v62, 1  ;;  %1618 = vmatpush3.bf16.msra.mxu0 %v1701_v57  ;;  %v2266_v16 = vpop.eup %1767  ;;  %v235_v60 = vmax.f32 %v233_v32, %v234_v34  ;;  %v291_v56 = vmax.f32 %v289_v37, %v290_v63  ;;  %v2277_v57 = vpop.xlane.xlu1 %161  ;;  %v1705_v32 = vld [vmem:[%s2730_s4] ss:$8 sps:$4 sm:$0xff]   ;;  %v1706_v37 = vld [vmem:[%s2730_s4 + $0x14] ss:$8 sps:$4 sm:$0xff]  }
  0xc3   :  { %1619 = vmatprep.subr.bf16.mxu0 %v2762_v9  ;;  %v2269_v28 = vpop.eup %1769  ;;  %v475_v63 = vrot.slane %v474_v36, 4  ;;  %996 = vmatpush1.bf16.msra.mxu1 %v1705_v32 }
  0xc4   :  { %1775 = vrcp.f32 %v424_v42  ;;  %v417_v38 = vadd.f32 %v416_v52, %v415_v62  ;;  %v359_v62 = vmul.f32 1.442695, %v321_v46  ;;  %v2279_v42 = vpop.xlane.xlu0 %159  ;;  %v286_v52 = vmax.f32 %v284_v23, %v285_v53  ;;  %v1708_v23 = vld [vmem:[%s2730_s4 + $0x10] ss:$8 sps:$4 sm:$0xff]   ;;  %997 = vmatprep.subr.bf16.mxu1 %v1706_v37 }
  0xc5   :  { %v2273_v33 = vpop.eup %1771  ;;  %v236_v34 = vrot.slane %v235_v60, 1  ;;  %v292_v18 = vrot.slane %v291_v56, 1  ;;  %v476_v13 = vadd.f32 %v475_v63, %v474_v36 }
  0xc6   :  { %1777 = vrcp.f32 %v417_v38  ;;  %1620 = vmatpush3.bf16.msra.mxu0 %v1702_v41  ;;  %v2275_v61 = vpop.eup %1773  ;;  %v471_v38 = vadd.f32 %v470_v21, %v469_v29  ;;  %v425_v41 = vadd.f32 %v2269_v28, %v2266_v16  ;;  %v1709_v29 = vld [vmem:[%s2730_s4 + $0x24] ss:$8 sps:$4 sm:$0xff]   ;;  %v337_v53 = vsub.f32 %v2195_v22, %v286_v52 }
  0xc7   :  { %1625 = vmatprep.subr.bf16.mxu0 %v2762_v9  ;;  %v481_v46 = vadd.f32 %v2275_v61, %v2273_v33  ;;  %v238_v9 = vmax.f32 %v2279_v42, %v2277_v57  ;;  %1779 = vpow2.f32 %v359_v62  ;;  %v338_v21 = vsub.f32 %v2193_v27, %v286_v52  ;;  %998 = vmatpush1.bf16.msra.mxu1 %v1708_v23 }
  0xc8   :  { %1781 = vpow2.f32 %v361_v44  ;;  %v237_v45 = vmax.f32 %v235_v60, %v236_v34  ;;  %v472_v12 = vrot.slane %v471_v38, 1  ;;  %v426_v62 = vrot.slane %v425_v41, 4  ;;  %v1711_v44 = vld [vmem:[%s2730_s4 + $0x20] ss:$8 sps:$4 sm:$0xff]   ;;  %999 = vmatprep.subr.bf16.mxu1 %v1709_v29 }
  0xc9   :  { %v482_v37 = vrot.slane %v481_v46, 4  ;;  %v293_v4 = vmax.f32 %v291_v56, %v292_v18  ;;  %v239_v5 = vrot.slane %v238_v9, 4  ;;  %v2801_v22 = vunpack.c.h.bf16 %v1951_v0  ;;  %v1712_v18 = vld [vmem:[%s2730_s4 + $0x34] ss:$8 sps:$4 sm:$0xff]  }
  0xca   :  { %v391_v36 = vmul.f32 1.442695, %v337_v53  ;;  %v393_v56 = vmul.f32 1.442695, %v338_v21  ;;  %v323_v52 = vsub.f32 %v2207_v1, %v237_v45  ;;  %v2803_v0 = vunpack.c.h.bf16 %v1961_v2  ;;  %v1714_v1 = vld [vmem:[%s2730_s4 + $0x30] ss:$8 sps:$4 sm:$0xff]  }
  0xcb   :  { %v339_v23 = vsub.f32 %v2243_v47, %v293_v4  ;;  %v240_v29 = vmax.f32 %v238_v9, %v239_v5  ;;  %1000 = vmatpush1.bf16.msra.mxu1 %v1711_v44  ;;  %v473_v53 = vadd.f32 %v472_v12, %v471_v38  ;;  %v483_v21 = vadd.f32 %v482_v37, %v481_v46  ;;  %v2341_v12 = vpop.xlane.xlu1 %193  ;;  %v2343_v38 = vpop.xlane.xlu0 %191  ;;  %v1718_v44 = vld [vmem:[%s2730_s4 + $0x54] ss:$8 sps:$4 sm:$0xff]  }
  0xcc   :  { %1001 = vmatprep.subr.bf16.mxu1 %v1712_v18  ;;  %1783 = vpow2.f32 %v391_v36  ;;  %v294_v18 = vmax.f32 %v2343_v38, %v2341_v12  ;;  %v1721_v36 = vld [vmem:[%s2730_s4 + $0x64] ss:$8 sps:$4 sm:$0xff]  }
  0xcd   :  { %1785 = vpow2.f32 %v393_v56  ;;  %v484_v46 = vrot.slane %v483_v21, 2 }
  0xce   :  { %v1776_v39 = vpop.eup %1775  ;;  %1787 = vrcp.f32 %v473_v53 }
  0xcf   :  { %v541_v19 = vmul.f32 %v1776_v39, %v2211_v51  ;;  %v542_v32 = vmul.f32 %v1776_v39, %v2217_v48  ;;  %1002 = vmatpush1.bf16.msra.mxu1 %v1714_v1  ;;  %v2361_v56 = vpop.xlane.xlu1 %165 }
  0xd0   :  { %v1778_v6 = vpop.eup %1777 }
  0xd1   :  { %v573_v27 = vmul.f32 %v1496_v3, %v541_v19  ;;  %v574_v51 = vmul.f32 %v2801_v22, %v542_v32  ;;  %v539_v48 = vmul.f32 %v1778_v6, %v2221_v10  ;;  %v540_v60 = vmul.f32 %v1778_v6, %v2228_v26 }
  0xd2   :  { %v2802_v3 = vunpack.c.l.bf16 %v1961_v2  ;;  %v324_v10 = vsub.f32 %v2205_v50, %v237_v45  ;;  %v477_v6 = vrot.slane %v476_v13, 2  ;;  %v427_v26 = vadd.f32 %v426_v62, %v425_v41  ;;  %v1715_v2 = vld [vmem:[%s2730_s4 + $0x44] ss:$8 sps:$4 sm:$0xff]   ;;  %v2337_v41 = vpop.eup %1779 }
  0xd3   :  { %v2320_v34 = vadd.f32 %v574_v51, %v573_v27  ;;  %v572_v63 = vmul.f32 %v2803_v0, %v540_v60  ;;  %v340_v32 = vsub.f32 %v2241_v11, %v293_v4  ;;  %v363_v50 = vmul.f32 1.442695, %v323_v52  ;;  %v2339_v9 = vpop.eup %1781  ;;  %v1717_v4 = vld [vmem:[%s2730_s4 + $0x40] ss:$8 sps:$4 sm:$0xff]   ;;  %1003 = vmatprep.subr.bf16.mxu1 %v1715_v2  ;;  %v2363_v52 = vpop.xlane.xlu0 %163 }
  0xd4   :  { %v571_v19 = vmul.f32 %v2802_v3, %v539_v48  ;;  %v365_v5 = vmul.f32 1.442695, %v324_v10  ;;  %v428_v47 = vrot.slane %v427_v26, 2  ;;  %v395_v45 = vmul.f32 1.442695, %v339_v23  ;;  %1004 = vmatpush1.bf16.msra.mxu1 %v1717_v4  ;;  %v2371_v2 = vpop.xlane.xlu1 %197 }
  0xd5   :  { %v241_v62 = vrot.slane %v240_v29, 2  ;;  %v478_v11 = vadd.f32 %v477_v6, %v476_v13  ;;  %v397_v37 = vmul.f32 1.442695, %v340_v32  ;;  %1789 = vpow2.f32 %v363_v50  ;;  %v1720_v13 = vld [vmem:[%s2730_s4 + $0x50] ss:$8 sps:$4 sm:$0xff]   ;;  %1005 = vmatprep.subr.bf16.mxu1 %v1718_v44 }
  0xd6   :  { %v2331_v39 = vadd.f32 %v572_v63, %v571_v19  ;;  %v432_v27 = vadd.f32 %v2339_v9, %v2337_v41  ;;  %1791 = vpow2.f32 %v365_v5  ;;  %v429_v22 = vadd.f32 %v428_v47, %v427_v26  ;;  %v2365_v63 = vpop.eup %1783 }
  0xd7   :  { %1793 = vpow2.f32 %v395_v45  ;;  %v242_v51 = vmax.f32 %v240_v29, %v241_v62  ;;  %v479_v48 = vrot.slane %v478_v11, 1  ;;  %v485_v60 = vadd.f32 %v484_v46, %v483_v21  ;;  %v2367_v23 = vpop.eup %1785  ;;  %v2373_v50 = vpop.xlane.xlu0 %195 }
  0xd8   :  { %1795 = vpow2.f32 %v397_v37  ;;  %v433_v3 = vrot.slane %v432_v27, 4  ;;  %v430_v19 = vrot.slane %v429_v22, 1  ;;  %1006 = vmatpush1.bf16.msra.mxu1 %v1720_v13  ;;  %v295_v26 = vrot.slane %v294_v18, 4  ;;  %v1788_v29 = vpop.eup %1787 }
  0xd9   :  { %v243_v0 = vrot.slane %v242_v51, 1  ;;  %v480_v10 = vadd.f32 %v479_v48, %v478_v11  ;;  %v486_v6 = vrot.slane %v485_v60, 1  ;;  %1007 = vmatprep.subr.bf16.mxu1 %v1721_v36  ;;  %v245_v11 = vmax.f32 %v2363_v52, %v2361_v56 }
  0xda   :  { %v434_v1 = vadd.f32 %v433_v3, %v432_v27  ;;  %v431_v21 = vadd.f32 %v430_v19, %v429_v22  ;;  %v296_v45 = vmax.f32 %v294_v18, %v295_v26  ;;  %v555_v44 = vmul.f32 %v1788_v29, %v2236_v58  ;;  %v2393_v58 = vpop.xlane.xlu1 %169 }
  0xdb   :  { %v244_v32 = vmax.f32 %v242_v51, %v243_v0  ;;  %1797 = vrcp.f32 %v480_v10  ;;  %v487_v47 = vadd.f32 %v486_v6, %v485_v60  ;;  %v488_v27 = vadd.f32 %v2367_v23, %v2365_v63  ;;  %v2395_v3 = vpop.xlane.xlu0 %167 }
  0xdc   :  { %v435_v37 = vrot.slane %v434_v1, 2  ;;  %1799 = vrcp.f32 %v431_v21  ;;  %v556_v51 = vmul.f32 %v1788_v29, %v2239_v43  ;;  %v297_v48 = vrot.slane %v296_v45, 2 }
  0xdd   :  { %v325_v4 = vsub.f32 %v2279_v42, %v244_v32  ;;  %v326_v22 = vsub.f32 %v2277_v57, %v244_v32  ;;  %1801 = vrcp.f32 %v487_v47  ;;  %v246_v36 = vrot.slane %v245_v11, 4 }
  0xde   :  { %v2397_v19 = vadd.f32 %v435_v37, %v434_v1  ;;  %v298_v57 = vmax.f32 %v296_v45, %v297_v48  ;;  %v301_v43 = vmax.f32 %v2373_v50, %v2371_v2  ;;  %v611_v0 = vrot.slane %v2320_v34, 4 }
  0xdf   :  { %v2369_v53 = vpop.eup %1789  ;;  %v367_v13 = vmul.f32 1.442695, %v325_v4  ;;  %v369_v18 = vmul.f32 1.442695, %v326_v22  ;;  %v489_v10 = vrot.slane %v488_v27, 4  ;;  %v247_v6 = vmax.f32 %v245_v11, %v246_v36 }
  0xe0   :  { %v2375_v5 = vpop.eup %1791  ;;  %v2804_v26 = vunpack.c.l.bf16 %v1970_v7  ;;  %v299_v21 = vrot.slane %v298_v57, 1  ;;  %v302_v32 = vrot.slane %v301_v43, 4  ;;  %v252_v1 = vmax.f32 %v2395_v3, %v2393_v58 }
  0xe1   :  { %v2377_v62 = vpop.eup %1793  ;;  %v439_v42 = vadd.f32 %v2375_v5, %v2369_v53  ;;  %1803 = vpow2.f32 %v367_v13  ;;  %v2805_v47 = vunpack.c.h.bf16 %v1970_v7  ;;  %v248_v22 = vrot.slane %v247_v6, 2 }
  0xe2   :  { %v2382_v46 = vpop.eup %1795  ;;  %1805 = vpow2.f32 %v369_v18  ;;  %v2404_v29 = vmul.f32 %v2804_v26, %v555_v44  ;;  %v437_v48 = vrot.slane %v2397_v19, 1  ;;  %v300_v11 = vmax.f32 %v298_v57, %v299_v21  ;;  %v2427_v21 = vpop.xlane.xlu0 %199 }
  0xe3   :  { %v495_v60 = vadd.f32 %v2382_v46, %v2377_v62  ;;  %v2410_v45 = vmul.f32 %v2805_v47, %v556_v51  ;;  %v440_v4 = vrot.slane %v439_v42, 4  ;;  %v303_v18 = vmax.f32 %v301_v43, %v302_v32 }
  0xe4   :  { %v253_v36 = vrot.slane %v252_v1, 4  ;;  %v2414_v44 = vadd.f32 %v611_v0, %v2320_v34  ;;  %v604_v26 = vrot.slane %v2331_v39, 4  ;;  %v490_v31 = vadd.f32 %v489_v10, %v488_v27  ;;  %v2425_v0 = vpop.xlane.xlu1 %201 }
  0xe5   :  { %v496_v37 = vrot.slane %v495_v60, 4  ;;  %v1798_v13 = vpop.eup %1797  ;;  %v249_v17 = vmax.f32 %v247_v6, %v248_v22  ;;  %v341_v7 = vsub.f32 %v2343_v38, %v300_v11  ;;  %v342_v51 = vsub.f32 %v2341_v12, %v300_v11 }
  0xe6   :  { %v304_v47 = vrot.slane %v303_v18, 2  ;;  %v254_v8 = vmax.f32 %v252_v1, %v253_v36  ;;  %v2419_v59 = vpop.eup %1799  ;;  %v557_v54 = vmul.f32 %v1798_v13, %v2257_v24  ;;  %v2423_v57 = vmul.f32 %v1798_v13, %v2259_v55 }
  0xe7   :  { %v441_v43 = vadd.f32 %v440_v4, %v439_v42  ;;  %v497_v34 = vadd.f32 %v496_v37, %v495_v60  ;;  %v2429_v27 = vpop.eup %1801  ;;  %v399_v38 = vmul.f32 1.442695, %v341_v7  ;;  %v401_v10 = vmul.f32 1.442695, %v342_v51 }
  0xe8   :  { %v250_v12 = vrot.slane %v249_v17, 1  ;;  %v305_v6 = vmax.f32 %v303_v18, %v304_v47  ;;  %v613_v32 = vrot.slane %v2414_v44, 2  ;;  %v605_v1 = vadd.f32 %v604_v26, %v2331_v39 }
  0xe9   :  { %v491_v24 = vrot.slane %v490_v31, 2  ;;  %v255_v22 = vrot.slane %v254_v8, 2  ;;  %1807 = vpow2.f32 %v399_v38  ;;  %v308_v4 = vmax.f32 %v2427_v21, %v2425_v0 }
  0xea   :  { %v251_v42 = vmax.f32 %v249_v17, %v250_v12  ;;  %v306_v60 = vrot.slane %v305_v6, 1  ;;  %v442_v13 = vrot.slane %v441_v43, 2  ;;  %v498_v11 = vrot.slane %v497_v34, 2 }
  0xeb   :  { %v2433_v55 = vpop.eup %1803  ;;  %1809 = vpow2.f32 %v401_v10  ;;  %v256_v18 = vmax.f32 %v254_v8, %v255_v22  ;;  %v606_v51 = vrot.slane %v605_v1, 2  ;;  %v492_v17 = vadd.f32 %v491_v24, %v490_v31 }
  0xec   :  { %v2437_v37 = vpop.eup %1805  ;;  %v327_v39 = vsub.f32 %v2363_v52, %v251_v42  ;;  %v328_v26 = vsub.f32 %v2361_v56, %v251_v42  ;;  %v307_v7 = vmax.f32 %v305_v6, %v306_v60  ;;  %v309_v38 = vrot.slane %v308_v4, 4 }
  0xed   :  { %2806 = vst [vmem:[#allocation15_spill] sm:$0xff] %v2437_v37  ;;  %v446_v36 = vadd.f32 %v2437_v37, %v2433_v55  ;;  %v257_v47 = vrot.slane %v256_v18, 1  ;;  %v443_v30 = vadd.f32 %v442_v13, %v441_v43  ;;  %v499_v25 = vadd.f32 %v498_v11, %v497_v34 }
  0xee   :  { %v371_v49 = vmul.f32 1.442695, %v327_v39  ;;  %v373_v40 = vmul.f32 1.442695, %v328_v26  ;;  %v343_v35 = vsub.f32 %v2373_v50, %v307_v7  ;;  %v344_v8 = vsub.f32 %v2371_v2, %v307_v7 }
  0xef   :  { %v447_v12 = vrot.slane %v446_v36, 4  ;;  %v258_v10 = vmax.f32 %v256_v18, %v257_v47  ;;  %v310_v22 = vmax.f32 %v308_v4, %v309_v38  ;;  %v438_v24 = vadd.f32 %v437_v48, %v2397_v19 }
  0xf0   :  { %1811 = vpow2.f32 %v371_v49  ;;  %v403_v52 = vmul.f32 1.442695, %v343_v35  ;;  %v405_v56 = vmul.f32 1.442695, %v344_v8  ;;  %v493_v42 = vrot.slane %v492_v17, 1 }
  0xf1   :  { %v448_v37 = vadd.f32 %v447_v12, %v446_v36  ;;  %1813 = vpow2.f32 %v373_v40  ;;  %v329_v31 = vsub.f32 %v2395_v3, %v258_v10  ;;  %v330_v6 = vsub.f32 %v2393_v58, %v258_v10 }
  0xf2   :  { %1815 = vpow2.f32 %v403_v52  ;;  %v311_v43 = vrot.slane %v310_v22, 2  ;;  %v614_v49 = vadd.f32 %v613_v32, %v2414_v44  ;;  %v2807_v35 = vunpack.c.l.bf16 %v1989_v14 }
  0xf3   :  { %v449_v60 = vrot.slane %v448_v37, 2  ;;  %1817 = vpow2.f32 %v405_v56  ;;  %v375_v50 = vmul.f32 1.442695, %v329_v31  ;;  %v377_v2 = vmul.f32 1.442695, %v330_v6  ;;  %v2448_v4 = vpop.eup %1807 }
  0xf4   :  { %v589_v40 = vmul.f32 %v2807_v35, %v557_v54  ;;  %v444_v34 = vrot.slane %v443_v30, 1  ;;  %v607_v58 = vadd.f32 %v606_v51, %v605_v1  ;;  %v500_v19 = vrot.slane %v499_v25, 1 }
  0xf5   :  { %v450_v3 = vadd.f32 %v449_v60, %v448_v37  ;;  %v2453_v13 = vpop.eup %1809  ;;  %1819 = vpow2.f32 %v375_v50  ;;  %v312_v48 = vmax.f32 %v310_v22, %v311_v43  ;;  %v2808_v11 = vunpack.c.h.bf16 %v1989_v14 }
  0xf6   :  { %v502_v39 = vadd.f32 %v2453_v13, %v2448_v4  ;;  %1821 = vpow2.f32 %v377_v2  ;;  %v494_v44 = vadd.f32 %v493_v42, %v492_v17  ;;  %v615_v54 = vrot.slane %v614_v49, 1 }
  0xf7   :  { %v590_v18 = vmul.f32 %v2808_v11, %v2423_v57  ;;  %v451_v36 = vrot.slane %v450_v3, 1  ;;  %v313_v32 = vrot.slane %v312_v48, 1  ;;  %v445_v26 = vadd.f32 %v444_v34, %v443_v30 }
  0xf8   :  { %v503_v37 = vrot.slane %v502_v39, 4  ;;  %v608_v7 = vrot.slane %v607_v58, 1  ;;  %v659_v1 = vadd.f32 %v2410_v45, %v2404_v29  ;;  %v501_v51 = vadd.f32 %v500_v19, %v499_v25 }
  0xf9   :  { %v314_v47 = vmax.f32 %v312_v48, %v313_v32  ;;  %v666_v14 = vadd.f32 %v590_v18, %v589_v40  ;;  %1823 = vrcp.f32 %v438_v24  ;;  %v452_v57 = vadd.f32 %v451_v36, %v450_v3 }
  0xfa   :  { %v2462_v38 = vpop.eup %1811  ;;  %v504_v12 = vadd.f32 %v503_v37, %v502_v39  ;;  %v543_v17 = vmul.f32 %v2419_v59, %v2266_v16  ;;  %1825 = vrcp.f32 %v494_v44  ;;  %v616_v25 = vadd.f32 %v615_v54, %v614_v49 }
  0xfb   :  { %v2464_v8 = vpop.eup %1813  ;;  %v345_v30 = vsub.f32 %v2427_v21, %v314_v47  ;;  %v346_v10 = vsub.f32 %v2425_v0, %v314_v47  ;;  %1827 = vrcp.f32 %v445_v26  ;;  %v609_v56 = vadd.f32 %v608_v7, %v607_v58 }
  0xfc   :  { %v2470_v22 = vpop.eup %1815  ;;  %v505_v29 = vrot.slane %v504_v12, 2  ;;  %v453_v45 = vadd.f32 %v2464_v8, %v2462_v38  ;;  %1829 = vrcp.f32 %v501_v51  ;;  %v660_v42 = vrot.slane %v659_v1, 4 }
  0xfd   :  { %v2474_v52 = vpop.eup %1817  ;;  %v407_v31 = vmul.f32 1.442695, %v345_v30  ;;  %v409_v6 = vmul.f32 1.442695, %v346_v10  ;;  %1831 = vrcp.f32 %v452_v57  ;;  %v544_v60 = vmul.f32 %v2419_v59, %v2269_v28 }
  0xfe   :  { %v506_v16 = vadd.f32 %v505_v29, %v504_v12  ;;  %v454_v24 = vrot.slane %v453_v45, 4  ;;  %v509_v0 = vadd.f32 %v2474_v52, %v2470_v22  ;;  %v667_v35 = vrot.slane %v666_v14, 4 }
  0xff   :  { %v2478_v21 = vpop.eup %1819  ;;  %1833 = vpow2.f32 %v407_v31  ;;  %v2809_v40 = vunpack.c.l.bf16 %v1994_v15  ;;  %v715_v58 = vpack.c.bf16 %v609_v56, %v609_v56  ;;  %v716_v18 = vpack.c.bf16 %v616_v25, %v616_v25 }
 0x100   :  { %v2482_v50 = vpop.eup %1821  ;;  %v507_v2 = vrot.slane %v506_v16, 1  ;;  %v455_v43 = vadd.f32 %v454_v24, %v453_v45  ;;  %v510_v49 = vrot.slane %v509_v0, 4  ;;  %1835 = vpow2.f32 %v409_v6 }
 0x101   :  { %v575_v34 = vmul.f32 %v2809_v40, %v543_v17  ;;  %v460_v3 = vadd.f32 %v2482_v50, %v2478_v21  ;;  %v2810_v59 = vunpack.c.h.bf16 %v1994_v15  ;;  %v559_v36 = vmul.f32 %v2429_v27, %v2273_v33  ;;  %v2813_v40 = vld [vmem:[#allocation15_spill] sm:$0xff] }
 0x102   :  { %v508_v19 = vadd.f32 %v507_v2, %v506_v16  ;;  %v456_v48 = vrot.slane %v455_v43, 2  ;;  %v511_v11 = vadd.f32 %v510_v49, %v509_v0  ;;  %v560_v39 = vmul.f32 %v2429_v27, %v2275_v61 }
 0x103   :  { %v576_v28 = vmul.f32 %v2810_v59, %v544_v60  ;;  %v461_v44 = vrot.slane %v460_v3, 4  ;;  %v1824_v32 = vpop.eup %1823  ;;  %v2494_v7 = vadd.f32 %v660_v42, %v659_v1  ;;  %v2496_v51 = vadd.f32 %v667_v35, %v666_v14  ;;  %v2817_v59 = vld [vmem:[#allocation6_spill] sm:$0xff] }
 0x104   :  { %1837 = vrcp.f32 %v508_v19  ;;  %v457_v54 = vadd.f32 %v456_v48, %v455_v43  ;;  %v512_v26 = vrot.slane %v511_v11, 2  ;;  %v1826_v37 = vpop.eup %1825  ;;  %v770_v17 = vunpack.c.l.b16 %v715_v58 }
 0x105   :  { %v462_v47 = vadd.f32 %v461_v44, %v460_v3  ;;  %v1828_v15 = vpop.eup %1827  ;;  %v771_v33 = vunpack.c.l.b16 %v716_v18  ;;  %v2498_v10 = vadd.f32 %v576_v28, %v575_v34  ;;  %v2811_v61 = vunpack.c.l.bf16 %v2007_v20  ;;  %v2820_v44 = vld [vmem:[#allocation7_spill] sm:$0xff] }
 0x106   :  { %v458_v57 = vrot.slane %v457_v54, 1  ;;  %v513_v12 = vadd.f32 %v512_v26, %v511_v11  ;;  %v1830_v30 = vpop.eup %1829  ;;  %v2812_v25 = vunpack.c.h.bf16 %v2007_v20  ;;  %v545_v14 = vmul.f32 %v1824_v32, %v2337_v41 }
 0x107   :  { %v591_v27 = vmul.f32 %v2811_v61, %v559_v36  ;;  %v463_v1 = vrot.slane %v462_v47, 2  ;;  %v1832_v45 = vpop.eup %1831  ;;  %v546_v56 = vmul.f32 %v1824_v32, %v2339_v9  ;;  %v561_v24 = vmul.f32 %v1826_v37, %v2365_v63  ;;  %v2826_v61 = vld [vmem:[#allocation9_spill] sm:$0xff] }
 0x108   :  { %v592_v29 = vmul.f32 %v2812_v25, %v560_v39  ;;  %v459_v31 = vadd.f32 %v458_v57, %v457_v54  ;;  %v514_v6 = vrot.slane %v513_v12, 1  ;;  %v562_v0 = vmul.f32 %v1826_v37, %v2367_v23  ;;  %v2823_v57 = vld [vmem:[#allocation8_spill] sm:$0xff] }
 0x109   :  { %v2506_v16 = vpop.eup %1833  ;;  %v547_v42 = vmul.f32 %v1828_v15, %v2369_v53  ;;  %v464_v60 = vadd.f32 %v463_v1, %v462_v47  ;;  %v548_v20 = vmul.f32 %v1828_v15, %v2375_v5  ;;  %v2515_v41 = vsel %vm786_vm1, %v771_v33, %v770_v17  ;;  %v2814_v5 = vld [vmem:[#allocation5_spill] sm:$0xff] }
 0x10a   :  { %v2511_v2 = vpop.eup %1835  ;;  %1839 = vrcp.f32 %v459_v31  ;;  %v515_v43 = vadd.f32 %v514_v6, %v513_v12  ;;  %v673_v9 = vadd.f32 %v592_v29, %v591_v27  ;;  %v563_v49 = vmul.f32 %v1830_v30, %v2377_v62 }
 0x10b   :  { %v465_v35 = vrot.slane %v464_v60, 1  ;;  %v516_v63 = vadd.f32 %v2511_v2, %v2506_v16  ;;  %v564_v23 = vmul.f32 %v1830_v30, %v2382_v46  ;;  %v549_v53 = vmul.f32 %v1832_v45, %v2433_v55 }
 0x10c   :  { %v550_v34 = vmul.f32 %v1832_v45, %v2813_v40  ;;  %1841 = vrcp.f32 %v515_v43  ;;  %v2815_v3 = vunpack.c.l.bf16 %v2814_v5  ;;  %v2816_v19 = vunpack.c.h.bf16 %v2814_v5  ;;  %v2829_v45 = vld [vmem:[#allocation10_spill] sm:$0xff] }
 0x10d   :  { %v466_v11 = vadd.f32 %v465_v35, %v464_v60  ;;  %v517_v18 = vrot.slane %v516_v63, 4  ;;  %v2818_v28 = vunpack.c.l.bf16 %v2817_v59  ;;  %v2819_v39 = vunpack.c.h.bf16 %v2817_v59 }
 0x10e   :  { %v577_v58 = vmul.f32 %v2815_v3, %v545_v14  ;;  %v578_v48 = vmul.f32 %v2816_v19, %v546_v56  ;;  %v1838_v62 = vpop.eup %1837  ;;  %v2821_v55 = vunpack.c.l.bf16 %v2820_v44  ;;  %v2822_v54 = vunpack.c.h.bf16 %v2820_v44 }
 0x10f   :  { %v593_v36 = vmul.f32 %v2818_v28, %v561_v24  ;;  %v594_v46 = vmul.f32 %v2819_v39, %v562_v0  ;;  %v565_v37 = vmul.f32 %v1838_v62, %v2448_v4  ;;  %v566_v47 = vmul.f32 %v1838_v62, %v2453_v13 }
 0x110   :  { %v579_v32 = vmul.f32 %v2821_v55, %v547_v42  ;;  %v580_v26 = vmul.f32 %v2822_v54, %v548_v20  ;;  %1843 = vrcp.f32 %v466_v11  ;;  %v518_v15 = vadd.f32 %v517_v18, %v516_v63  ;;  %v2832_v18 = vld [vmem:[#allocation11_spill] sm:$0xff] }
 0x111   :  { %v2824_v12 = vunpack.c.l.bf16 %v2823_v57  ;;  %v2825_v33 = vunpack.c.h.bf16 %v2823_v57  ;;  %v2827_v27 = vunpack.c.l.bf16 %v2826_v61  ;;  %v2828_v29 = vunpack.c.h.bf16 %v2826_v61 }
 0x112   :  { %v2830_v14 = vunpack.c.l.bf16 %v2829_v45  ;;  %v2831_v4 = vunpack.c.h.bf16 %v2829_v45  ;;  %v519_v31 = vrot.slane %v518_v15, 2  ;;  %v618_v6 = vrot.slane %v2498_v10, 4 }
 0x113   :  { %v595_v17 = vmul.f32 %v2824_v12, %v563_v49  ;;  %v596_v30 = vmul.f32 %v2825_v33, %v564_v23  ;;  %v581_v25 = vmul.f32 %v2827_v27, %v549_v53  ;;  %v582_v1 = vmul.f32 %v2828_v29, %v550_v34 }
 0x114   :  { %v597_v56 = vmul.f32 %v2830_v14, %v565_v37  ;;  %v598_v13 = vmul.f32 %v2831_v4, %v566_v47  ;;  %v674_v24 = vrot.slane %v673_v9, 4  ;;  %v624_v0 = vadd.f32 %v578_v48, %v577_v58  ;;  %v1840_v43 = vpop.eup %1839 }
 0x115   :  { %v680_v42 = vadd.f32 %v594_v46, %v593_v36  ;;  %v662_v60 = vrot.slane %v2494_v7, 2  ;;  %v520_v20 = vadd.f32 %v519_v31, %v518_v15  ;;  %v669_v49 = vrot.slane %v2496_v51, 2 }
 0x116   :  { %v631_v35 = vadd.f32 %v580_v26, %v579_v32  ;;  %v687_v63 = vadd.f32 %v596_v30, %v595_v17  ;;  %v638_v23 = vadd.f32 %v582_v1, %v581_v25  ;;  %v694_v53 = vadd.f32 %v598_v13, %v597_v56  ;;  %v1842_v3 = vpop.eup %1841  ;;  %v2838_v25 = vld [vmem:[#allocation13_spill] sm:$0xff] }
 0x117   :  { %v551_v40 = vmul.f32 %v1840_v43, %v2462_v38  ;;  %v552_v34 = vmul.f32 %v1840_v43, %v2464_v8  ;;  %v521_v5 = vrot.slane %v520_v20, 1  ;;  %v619_v19 = vadd.f32 %v618_v6, %v2498_v10 }
 0x118   :  { %v675_v58 = vadd.f32 %v674_v24, %v673_v9  ;;  %v625_v48 = vrot.slane %v624_v0, 4  ;;  %v681_v11 = vrot.slane %v680_v42, 4  ;;  %v2833_v62 = vunpack.c.l.bf16 %v2832_v18  ;;  %v2835_v9 = vld [vmem:[#allocation12_spill] sm:$0xff] }
 0x119   :  { %v2834_v28 = vunpack.c.h.bf16 %v2832_v18  ;;  %v567_v39 = vmul.f32 %v1842_v3, %v2470_v22  ;;  %v568_v46 = vmul.f32 %v1842_v3, %v2474_v52  ;;  %v632_v38 = vrot.slane %v631_v35, 4 }
 0x11a   :  { %v583_v59 = vmul.f32 %v2833_v62, %v551_v40  ;;  %v688_v44 = vrot.slane %v687_v63, 4  ;;  %v639_v8 = vrot.slane %v638_v23, 4  ;;  %v522_v55 = vadd.f32 %v521_v5, %v520_v20  ;;  %v1844_v32 = vpop.eup %1843 }
 0x11b   :  { %v584_v36 = vmul.f32 %v2834_v28, %v552_v34  ;;  %v695_v54 = vrot.slane %v694_v53, 4  ;;  %v2836_v26 = vunpack.c.l.bf16 %v2835_v9  ;;  %v2837_v47 = vunpack.c.h.bf16 %v2835_v9 }
 0x11c   :  { %v626_v57 = vadd.f32 %v625_v48, %v624_v0  ;;  %v553_v12 = vmul.f32 %v1844_v32, %v2478_v21  ;;  %v554_v22 = vmul.f32 %v1844_v32, %v2482_v50  ;;  %1845 = vrcp.f32 %v522_v55  ;;  %v2841_v55 = vld [vmem:[#allocation14_spill] sm:$0xff] }
 0x11d   :  { %v645_v10 = vadd.f32 %v584_v36, %v583_v59  ;;  %v599_v37 = vmul.f32 %v2836_v26, %v567_v39  ;;  %v600_v15 = vmul.f32 %v2837_v47, %v568_v46  ;;  %v620_v52 = vrot.slane %v619_v19, 2 }
 0x11e   :  { %v682_v17 = vadd.f32 %v681_v11, %v680_v42  ;;  %v633_v61 = vadd.f32 %v632_v38, %v631_v35  ;;  %v689_v27 = vadd.f32 %v688_v44, %v687_v63  ;;  %v2839_v29 = vunpack.c.l.bf16 %v2838_v25 }
 0x11f   :  { %v701_v33 = vadd.f32 %v600_v15, %v599_v37  ;;  %v646_v30 = vrot.slane %v645_v10, 4  ;;  %v2840_v45 = vunpack.c.h.bf16 %v2838_v25  ;;  %v676_v56 = vrot.slane %v675_v58, 2 }
 0x120   :  { %v585_v1 = vmul.f32 %v2839_v29, %v553_v12  ;;  %v640_v4 = vadd.f32 %v639_v8, %v638_v23  ;;  %v696_v13 = vadd.f32 %v695_v54, %v694_v53  ;;  %v627_v21 = vrot.slane %v626_v57, 2 }
 0x121   :  { %v586_v14 = vmul.f32 %v2840_v45, %v554_v22  ;;  %v702_v31 = vrot.slane %v701_v33, 4  ;;  %v647_v6 = vadd.f32 %v646_v30, %v645_v10  ;;  %v663_v24 = vadd.f32 %v662_v60, %v2494_v7 }
 0x122   :  { %v670_v0 = vadd.f32 %v669_v49, %v2496_v51  ;;  %v683_v42 = vrot.slane %v682_v17, 2  ;;  %v621_v43 = vadd.f32 %v620_v52, %v619_v19  ;;  %v634_v35 = vrot.slane %v633_v61, 2 }
 0x123   :  { %v652_v50 = vadd.f32 %v586_v14, %v585_v1  ;;  %v703_v20 = vadd.f32 %v702_v31, %v701_v33  ;;  %v690_v40 = vrot.slane %v689_v27, 2  ;;  %v677_v34 = vadd.f32 %v676_v56, %v675_v58 }
 0x124   :  { %v641_v5 = vrot.slane %v640_v4, 2  ;;  %v697_v3 = vrot.slane %v696_v13, 2  ;;  %v628_v48 = vadd.f32 %v627_v21, %v626_v57  ;;  %v648_v23 = vrot.slane %v647_v6, 2 }
 0x125   :  { %v653_v63 = vrot.slane %v652_v50, 4  ;;  %v704_v11 = vrot.slane %v703_v20, 2  ;;  %v664_v18 = vrot.slane %v663_v24, 1  ;;  %v671_v62 = vrot.slane %v670_v0, 1 }
 0x126   :  { %v684_v59 = vadd.f32 %v683_v42, %v682_v17  ;;  %v1846_v28 = vpop.eup %1845  ;;  %v622_v7 = vrot.slane %v621_v43, 1  ;;  %v635_v60 = vadd.f32 %v634_v35, %v633_v61  ;;  %v691_v49 = vadd.f32 %v690_v40, %v689_v27 }
 0x127   :  { %v654_v53 = vadd.f32 %v653_v63, %v652_v50  ;;  %v569_v19 = vmul.f32 %v1846_v28, %v2506_v16  ;;  %v570_v36 = vmul.f32 %v1846_v28, %v2511_v2  ;;  %v642_v39 = vadd.f32 %v641_v5, %v640_v4 }
 0x128   :  { %v698_v58 = vadd.f32 %v697_v3, %v696_v13  ;;  %v629_v46 = vrot.slane %v628_v48, 1  ;;  %v649_v38 = vadd.f32 %v648_v23, %v647_v6  ;;  %v678_v44 = vrot.slane %v677_v34, 1 }
 0x129   :  { %v655_v51 = vrot.slane %v654_v53, 2  ;;  %v705_v8 = vadd.f32 %v704_v11, %v703_v20  ;;  %v2842_v32 = vunpack.c.l.bf16 %v2841_v55  ;;  %v2843_v10 = vunpack.c.h.bf16 %v2841_v55 }
 0x12a   :  { %v685_v37 = vrot.slane %v684_v59, 1  ;;  %v623_v47 = vadd.f32 %v622_v7, %v621_v43  ;;  %v636_v15 = vrot.slane %v635_v60, 1  ;;  %v692_v57 = vrot.slane %v691_v49, 1 }
 0x12b   :  { %v601_v54 = vmul.f32 %v2842_v32, %v569_v19  ;;  %v602_v9 = vmul.f32 %v2843_v10, %v570_v36  ;;  %v656_v26 = vadd.f32 %v655_v51, %v654_v53  ;;  %v672_v16 = vadd.f32 %v671_v62, %v670_v0 }
 0x12c   :  { %v643_v12 = vrot.slane %v642_v39, 1  ;;  %v699_v2 = vrot.slane %v698_v58, 1  ;;  %v630_v52 = vadd.f32 %v629_v46, %v628_v48  ;;  %v650_v17 = vrot.slane %v649_v38, 1 }
 0x12d   :  { %v708_v22 = vadd.f32 %v602_v9, %v601_v54  ;;  %v679_v33 = vadd.f32 %v678_v44, %v677_v34  ;;  %v706_v30 = vrot.slane %v705_v8, 1  ;;  %v665_v61 = vadd.f32 %v664_v18, %v663_v24 }
 0x12e   :  { %v657_v27 = vrot.slane %v656_v26, 1  ;;  %v686_v25 = vadd.f32 %v685_v37, %v684_v59  ;;  %v637_v1 = vadd.f32 %v636_v15, %v635_v60  ;;  %v693_v45 = vadd.f32 %v692_v57, %v691_v49 }
 0x12f   :  { %v709_v29 = vrot.slane %v708_v22, 4  ;;  %v717_v14 = vpack.c.bf16 %v623_v47, %v623_v47  ;;  %v644_v56 = vadd.f32 %v643_v12, %v642_v39  ;;  %v700_v4 = vadd.f32 %v699_v2, %v698_v58 }
 0x130   :  { %v724_v31 = vpack.c.bf16 %v672_v16, %v672_v16  ;;  %v651_v21 = vadd.f32 %v650_v17, %v649_v38  ;;  %v707_v6 = vadd.f32 %v706_v30, %v705_v8  ;;  %v718_v50 = vpack.c.bf16 %v630_v52, %v630_v52  ;;  %v1724_v52 = vld [vmem:[%s2730_s4 + $0x74] ss:$8 sps:$4 sm:$0xff]   ;;  %v1726_v17 = vld [vmem:[%s2730_s4 + $0x70] ss:$8 sps:$4 sm:$0xff]   ;;  %v1439_v30 = vld [vmem:[%s2729_s3] ss:$0 sm:$0xff] }
 0x131   :  { %v710_v13 = vadd.f32 %v709_v29, %v708_v22  ;;  %v725_v0 = vpack.c.bf16 %v679_v33, %v679_v33  ;;  %v658_v42 = vadd.f32 %v657_v27, %v656_v26  ;;  %v723_v43 = vpack.c.bf16 %v665_v61, %v665_v61  ;;  %v1723_v22 = vld [vmem:[%s2730_s4 + $0x60] ss:$8 sps:$4 sm:$0xff]  }
 0x132   :  { %v726_v35 = vpack.c.bf16 %v686_v25, %v686_v25  ;;  %v719_v24 = vpack.c.bf16 %v637_v1, %v637_v1  ;;  %v727_v63 = vpack.c.bf16 %v693_v45, %v693_v45  ;;  %v772_v40 = vunpack.c.l.b16 %v717_v14  ;;  %1008 = vmatpush1.bf16.msra.mxu1 %v1723_v22 }
 0x133   :  { %v711_v20 = vrot.slane %v710_v13, 2  ;;  %v720_v5 = vpack.c.bf16 %v644_v56, %v644_v56  ;;  %v728_v3 = vpack.c.bf16 %v700_v4, %v700_v4  ;;  %v779_v48 = vunpack.c.l.b16 %v724_v31  ;;  %1009 = vmatprep.subr.bf16.mxu1 %v1724_v52  ;;  %v1464_v56 = vld [vmem:[%s2732_s6] ss:$0 sm:$0xff] }
 0x134   :  { %v721_v23 = vpack.c.bf16 %v651_v21, %v651_v21  ;;  %v729_v53 = vpack.c.bf16 %v707_v6, %v707_v6  ;;  %v773_v11 = vunpack.c.l.b16 %v718_v50  ;;  %v780_v18 = vunpack.c.l.b16 %v725_v0 }
 0x135   :  { %v712_v34 = vadd.f32 %v711_v20, %v710_v13  ;;  %v722_v59 = vpack.c.bf16 %v658_v42, %v658_v42  ;;  %v778_v28 = vunpack.c.l.b16 %v723_v43  ;;  %v781_v7 = vunpack.c.l.b16 %v726_v35  ;;  %v1727_v20 = vld [vmem:[%s2731_s5 + $0x40] sm:$0xff]   ;;  %v1728_v43 = vld [vmem:[%s2731_s5 + $0x48] sm:$0xff]   ;;  %v1729_v35 = vld [vmem:[%s2731_s5 + $0x50] sm:$0xff]  }
 0x136   :  { %v774_v60 = vunpack.c.l.b16 %v719_v24  ;;  %v782_v51 = vunpack.c.l.b16 %v727_v63  ;;  %v789_v49 = vsel %vm788_vm2, %v772_v40, %v2515_v41  ;;  %v775_v36 = vunpack.c.l.b16 %v720_v5  ;;  %1010 = vmatpush1.bf16.msra.mxu1 %v1726_v17  ;;  %v1730_v24 = vld [vmem:[%s2731_s5 + $0x58] sm:$0xff]  }
 0x137   :  { %v713_v62 = vrot.slane %v712_v34, 1  ;;  %v783_v39 = vunpack.c.l.b16 %v728_v3  ;;  %v800_v58 = vsel %vm786_vm1, %v779_v48, %v778_v28  ;;  %v776_v46 = vunpack.c.l.b16 %v721_v23 }
 0x138   :  { %v784_v38 = vunpack.c.l.b16 %v729_v53  ;;  %v791_v44 = vsel %vm790_vm3, %v773_v11, %v789_v49  ;;  %v801_v8 = vsel %vm788_vm2, %v780_v18, %v800_v58  ;;  %v777_v32 = vunpack.c.l.b16 %v722_v59  ;;  %v1731_v49 = vld [vmem:[%s2731_s5 + $0x60] sm:$0xff]  }
 0x139   :  { %v714_v19 = vadd.f32 %v713_v62, %v712_v34  ;;  %v802_v54 = vsel %vm790_vm3, %v781_v7, %v801_v8  ;;  %v793_v10 = vsel %vm792_vm4, %v774_v60, %v791_v44  ;;  %v2844_v2 = vmov 0.0   ;;  %v1743_v58 = vld [vmem:[%s2733_s7] sm:$0xff]   ;;  %v1746_v44 = vld [vmem:[%s2733_s7 + $0x18] sm:$0xff]  }
 0x13a   :  { %v803_v41 = vsel %vm792_vm4, %v782_v51, %v802_v54  ;;  %v795_v26 = vsel %vm794_vm5, %v775_v36, %v793_v10  ;;  %v1889_v33 = vmov 0   ;;  %1665 = vmatprep.subr.bf16.mxu1 %v2844_v2  ;;  %v1733_v36 = vld [vmem:[%s2731_s5 + $0x70] sm:$0xff]   ;;  %v1747_v8 = vld [vmem:[%s2733_s7 + $0x20] sm:$0xff]  }
 0x13b   :  { %v730_v55 = vpack.c.bf16 %v714_v19, %v714_v19  ;;  %v804_v37 = vsel %vm794_vm5, %v783_v39, %v803_v41  ;;  %v797_v47 = vsel %vm796_vm6, %v776_v46, %v795_v26  ;;  %1027 = vmatprep.mubr.bf16.mxu1 %v1889_v33  ;;  %v1732_v19 = vld [vmem:[%s2731_s5 + $0x68] sm:$0xff]   ;;  %v1734_v39 = vld [vmem:[%s2731_s5 + $0x78] sm:$0xff]  }
 0x13c   :  { %v805_v15 = vsel %vm796_vm6, %v784_v38, %v804_v37  ;;  %v799_v57 = vsel %vm798_vm7, %v777_v32, %v797_v47  ;;  %v1744_v46 = vld [vmem:[%s2733_s7 + $0x8] sm:$0xff]   ;;  %v1745_v38 = vld [vmem:[%s2733_s7 + $0x10] sm:$0xff]  }
 0x13d   :  { %v785_v9 = vunpack.c.l.b16 %v730_v55  ;;  %v1748_v55 = vld [vmem:[%s2733_s7 + $0x28] sm:$0xff]   ;;  %v1749_v32 = vld [vmem:[%s2733_s7 + $0x30] sm:$0xff]  }
 0x13f   :  { %v806_v16 = vsel %vm798_vm7, %v785_v9, %v805_v15 }
 0x140   :  { %v807_v12 = vpack.c.b16 %v806_v16, %v799_v57  ;;  %v1735_v16 = vld [vmem:[%s2731_s5] sm:$0xff]  }
 0x142   :  { %1622 = vmatmul.mubr.bf16.vlgmr.msra.gmra.mrb[0].mxu0 %v807_v12 }
 0x143   :  { %1641 = vmatprep.mubr.msk.bf16.mxu0 %vm1888_vm0, %v2844_v2  ;;  %1626 = vmatpush3.bf16.msra.mxu0 %v1727_v20 }
 0x144   :  { %1627 = vmatprep.subr.bf16.mxu0 %v2844_v2 }
 0x147   :  { %1628 = vmatpush3.bf16.msra.mxu0 %v1728_v43 }
 0x148   :  { %1629 = vmatprep.subr.bf16.mxu0 %v2844_v2 }
 0x14b   :  { %1630 = vmatpush3.bf16.msra.mxu0 %v1729_v35 }
 0x14c   :  { %1631 = vmatprep.subr.bf16.mxu0 %v2844_v2 }
 0x14f   :  { %1632 = vmatpush3.bf16.msra.mxu0 %v1730_v24 }
 0x150   :  { %1633 = vmatprep.subr.bf16.mxu0 %v2844_v2 }
 0x153   :  { %1634 = vmatpush3.bf16.msra.mxu0 %v1731_v49 }
 0x154   :  { %1635 = vmatprep.subr.bf16.mxu0 %v2844_v2 }
 0x157   :  { %1636 = vmatpush3.bf16.msra.mxu0 %v1732_v19 }
 0x158   :  { %1637 = vmatprep.subr.bf16.mxu0 %v2844_v2 }
 0x15b   :  { %1638 = vmatpush3.bf16.msra.mxu0 %v1733_v36 }
 0x15c   :  { %1639 = vmatprep.subr.bf16.mxu0 %v2844_v2 }
 0x15f   :  { %1640 = vmatpush3.bf16.msra.mxu0 %v1734_v39 }
 0x160   :  { %1645 = vmatprep.subr.bf16.mxu0 %v2844_v2 }
 0x215   :  { %v891_v61 = vpop.f32.mrb[0].mxu0 }
 0x216   :  { %v1623_v27 = vpop.f32.mrb[1].mxu0  ;;  %v892_v29 = vadd.f32 %v1439_v30, %v891_v61 }
 0x217   :  { %v894_v25 = vpop.f32.mrb[2].mxu0 }
 0x218   :  { %v895_v1 = vadd.f32 %v1439_v30, %v894_v25  ;;  %v1624_v45 = vpop.f32.mrb[3].mxu0  ;;  %v1736_v30 = vld [vmem:[%s2731_s5 + $0x8] sm:$0xff]  }
 0x219   :  { %v1739_v45 = vld [vmem:[%s2731_s5 + $0x20] sm:$0xff]  }
 0x21a   :  { %v898_v14 = vpack.c.bf16 %v895_v1, %v892_v29  ;;  %v1737_v29 = vld [vmem:[%s2731_s5 + $0x10] sm:$0xff]   ;;  %v1738_v1 = vld [vmem:[%s2731_s5 + $0x18] sm:$0xff]  }
 0x21c   :  { %1028 = vmatmul.mubr.bf16.vlgmr.msra.gmra.mrb[0].mxu1 %v898_v14  ;;  %v1740_v14 = vld [vmem:[%s2731_s5 + $0x28] sm:$0xff]  }
 0x21d   :  { %1681 = vmatprep.mubr.msk.bf16.mxu1 %vm1888_vm0, %v2844_v2  ;;  %1666 = vmatpush3.bf16.msra.mxu1 %v1743_v58 }
 0x21e   :  { %1667 = vmatprep.subr.bf16.mxu1 %v2844_v2 }
 0x221   :  { %1668 = vmatpush3.bf16.msra.mxu1 %v1744_v46 }
 0x222   :  { %1669 = vmatprep.subr.bf16.mxu1 %v2844_v2 }
 0x225   :  { %1670 = vmatpush3.bf16.msra.mxu1 %v1745_v38 }
 0x226   :  { %1671 = vmatprep.subr.bf16.mxu1 %v2844_v2 }
 0x229   :  { %1672 = vmatpush3.bf16.msra.mxu1 %v1746_v44 }
 0x22a   :  { %1673 = vmatprep.subr.bf16.mxu1 %v2844_v2 }
 0x22d   :  { %1674 = vmatpush3.bf16.msra.mxu1 %v1747_v8 }
 0x22e   :  { %1675 = vmatprep.subr.bf16.mxu1 %v2844_v2 }
 0x231   :  { %1676 = vmatpush3.bf16.msra.mxu1 %v1748_v55 }
 0x232   :  { %1677 = vmatprep.subr.bf16.mxu1 %v2844_v2 }
 0x235   :  { %1678 = vmatpush3.bf16.msra.mxu1 %v1749_v32 }
 0x236   :  { %1679 = vmatprep.subr.bf16.mxu1 %v2844_v2 }
 0x2ef   :  { %v1029_v4 = vpop.f32.mrb[0].mxu1 }
 0x2f0   :  { %v1031_v13 = vpop.f32.mrb[1].mxu1  ;;  %v1077_v0 = vadd.f32 %v1464_v56, %v1029_v4  ;;  %v1742_v4 = vld [vmem:[%s2731_s5 + $0x38] sm:$0xff]  }
 0x2f1   :  { %v1098_v31 = vadd.f32 %v1464_v56, %v1031_v13  ;;  %v1033_v21 = vpop.f32.mrb[2].mxu1 }
 0x2f2   :  { %v1035_v6 = vpop.f32.mrb[3].mxu1  ;;  %v1078_v42 = vadd.f32 %v1464_v56, %v1033_v21 }
 0x2f3   :  { %v1099_v50 = vadd.f32 %v1464_v56, %v1035_v6  ;;  %1100 = vmax.xlane.f32.xlu0 %v1098_v31  ;;  %v1741_v56 = vld [vmem:[%s2731_s5 + $0x30] sm:$0xff]   ;;  %s1863_s5 = scalar_lea.vmem %s1426_s27, 256 }
 0x2f4   :  { %p1864_p0 = scmp.ne.s32.totalorder %s1426_s27, %s1863_s5  ;;  %p1869_p2 = scmp.lt.s32.totalorder %s1863_s5, %s1863_s5 }
 0x2f5   :  { %1102 = vmax.xlane.f32.xlu1 %v1099_v50 }
 0x2f6   :  { %p1870_p3 = por %p1869_p2, %p1868_p1 }
 0x2f7   :  { %1079 = vmax.xlane.f32.xlu0 %v1077_v0 }
 0x2f8   :  { %p1871_p4 = pnand %p1870_p3, %p1864_p0 }
 0x2f9   :  { %1081 = vmax.xlane.f32.xlu1 %v1078_v42 }
 0x380   :  { %v1101_v63 = vpop.xlane.xlu0 %1100 }
 0x381   :  { %v1104_v40 = vsub.f32 %v1098_v31, %v1101_v63  ;;  %v1750_v31 = vld [vmem:[%s2733_s7 + $0x38] sm:$0xff]  }
 0x382   :  { %v1103_v34 = vpop.xlane.xlu1 %1102  ;;  %1680 = vmatpush3.bf16.msra.mxu1 %v1750_v31 }
 0x383   :  { %v1106_v5 = vmul.f32 1.442695, %v1104_v40  ;;  %v1105_v3 = vsub.f32 %v1099_v50, %v1103_v34 }
 0x384   :  { %v1080_v48 = vpop.xlane.xlu0 %1079 }
 0x385   :  { %1847 = vpow2.f32 %v1106_v5  ;;  %v1108_v23 = vmul.f32 1.442695, %v1105_v3  ;;  %v1083_v53 = vsub.f32 %v1077_v0, %v1080_v48 }
 0x386   :  { %v1082_v11 = vpop.xlane.xlu1 %1081 }
 0x387   :  { %1849 = vpow2.f32 %v1108_v23  ;;  %v1085_v18 = vmul.f32 1.442695, %v1083_v53  ;;  %v1084_v62 = vsub.f32 %v1078_v42, %v1082_v11 }
 0x389   :  { %1851 = vpow2.f32 %v1085_v18  ;;  %v1087_v59 = vmul.f32 1.442695, %v1084_v62 }
 0x38b   :  { %1853 = vpow2.f32 %v1087_v59 }
 0x38f   :  { %v1848_v28 = vpop.eup %1847 }
 0x390   :  { %1110 = vadd.xlane.f32.xlu0 %v1848_v28 }
 0x391   :  { %v1850_v7 = vpop.eup %1849 }
 0x392   :  { %1112 = vadd.xlane.f32.xlu1 %v1850_v7 }
 0x393   :  { %v1852_v60 = vpop.eup %1851 }
 0x394   :  { %1089 = vadd.xlane.f32.xlu0 %v1852_v60 }
 0x395   :  { %v1854_v51 = vpop.eup %1853 }
 0x396   :  { %1091 = vadd.xlane.f32.xlu1 %v1854_v51 }
 0x41d   :  { %v1111_v54 = vpop.xlane.xlu0 %1110 }
 0x41e   :  { %1855 = vrcp.f32 %v1111_v54 }
 0x41f   :  { %v1113_v10 = vpop.xlane.xlu1 %1112 }
 0x420   :  { %1857 = vrcp.f32 %v1113_v10 }
 0x421   :  { %v1090_v41 = vpop.xlane.xlu0 %1089 }
 0x422   :  { %1859 = vrcp.f32 %v1090_v41 }
 0x423   :  { %v1092_v9 = vpop.xlane.xlu1 %1091 }
 0x424   :  { %1861 = vrcp.f32 %v1092_v9 }
 0x428   :  { %v1856_v26 = vpop.eup %1855 }
 0x429   :  { %v1115_v47 = vmul.f32 %v1856_v26, %v1848_v28 }
 0x42a   :  { %v1858_v37 = vpop.eup %1857 }
 0x42b   :  { %v1117_v15 = vmul.f32 %v1858_v37, %v1850_v7 }
 0x42c   :  { %v1860_v57 = vpop.eup %1859 }
 0x42d   :  { %v1120_v12 = vpack.c.bf16 %v1117_v15, %v1115_v47  ;;  %v1094_v22 = vmul.f32 %v1860_v57, %v1852_v60 }
 0x42e   :  { %v1862_v52 = vpop.eup %1861 }
 0x42f   :  { %1642 = vmatmul.mubr.bf16.vlgmr.msra.gmra.mrb[4].mxu0 %v1120_v12  ;;  %v1096_v17 = vmul.f32 %v1862_v52, %v1854_v51  ;;  %v1118_v33 = vadd.f32 %v1115_v47, %v1094_v22 }
 0x430   :  { %1646 = vmatpush3.bf16.msra.mxu0 %v1735_v16  ;;  %1661 = vmatprep.mubr.msk.bf16.mxu0 %vm1888_vm0, %v2844_v2 }
 0x431   :  { %1647 = vmatprep.subr.bf16.mxu0 %v2844_v2  ;;  %v1119_v61 = vadd.f32 %v1117_v15, %v1096_v17  ;;  %v1299_v27 = vmul.f32 0.5, %v1118_v33  ;;  %v1097_v13 = vpack.c.bf16 %v1096_v17, %v1094_v22 }
 0x433   :  { %v1300_v25 = vmul.f32 0.5, %v1119_v61  ;;  %1301 = vst [vmem:[#allocation2] sm:$0xff] %v1299_v27 }
 0x434   :  { %1648 = vmatpush3.bf16.msra.mxu0 %v1736_v30 }
 0x435   :  { %1649 = vmatprep.subr.bf16.mxu0 %v2844_v2  ;;  %1302 = vst [vmem:[#allocation2 + $0x8] sm:$0xff] %v1300_v25 }
 0x438   :  { %1650 = vmatpush3.bf16.msra.mxu0 %v1737_v29 }
 0x439   :  { %1651 = vmatprep.subr.bf16.mxu0 %v2844_v2 }
 0x43c   :  { %1652 = vmatpush3.bf16.msra.mxu0 %v1738_v1 }
 0x43d   :  { %1653 = vmatprep.subr.bf16.mxu0 %v2844_v2 }
 0x440   :  { %1654 = vmatpush3.bf16.msra.mxu0 %v1739_v45 }
 0x441   :  { %1655 = vmatprep.subr.bf16.mxu0 %v2844_v2 }
 0x444   :  { %1656 = vmatpush3.bf16.msra.mxu0 %v1740_v14 }
 0x445   :  { %1657 = vmatprep.subr.bf16.mxu0 %v2844_v2 }
 0x448   :  { %1658 = vmatpush3.bf16.msra.mxu0 %v1741_v56 }
 0x449   :  { %1659 = vmatprep.subr.bf16.mxu0 %v2844_v2 }
 0x44c   :  { %1660 = vmatpush3.bf16.msra.mxu0 %v1742_v4 }
 0x44f   :  { %1662 = vmatmul.mubr.bf16.vlgmr.msra.gmra.mrb[4].mxu0 %v1097_v13 }
 0x522   :  { %v1292_v21 = vpop.f32.mrb[4].mxu0 }
 0x523   :  { %v1663_v6 = vpop.f32.mrb[5].mxu0 }
 0x524   :  { %v1295_v50 = vpop.f32.mrb[6].mxu0 }
 0x525   :  { %v1303_v0 = vpack.c.bf16 %v1295_v50, %v1292_v21  ;;  %v1664_v42 = vpop.f32.mrb[7].mxu0 }
 0x527   :  { %1682 = vmatmul.mubr.bf16.vlgmr.msra.gmra.mrb[4].mxu1 %v1303_v0 }
 0x528   :  { %1874 = shalt.err (!%p1871_p4)
}
 0x529   :  { %s1875_s7 = scalar_lea.hbm %s2736_s10, 256 }
 0x52a   :  { %p1876_p5 = scmp.ne.s32.totalorder %s2736_s10, %s1875_s7  ;;  %p1879_p6 = scmp.lt.u32.totalorder %s1875_s7, %s2736_s10 }
 0x52c   :  { %p1881_p7 = pnand %p1879_p6, %p1876_p5 }
 0x52e   :  { %1884 = shalt.err (!%p1881_p7)
}
 0x52f   :  { %s1891_s6 = smov 128   ;;  %s1892_s12 = smov 8   ;;  %v1481_v2 = vld [vmem:[%s2734_s8] ss:$0 sm:$0xff] }
 0x530   :  { %1431 = dma.vmem_to_hbm [thread:$0]  %s1426_s27, 256, %s2736_s10, [#allocation3], %s1891_s6, %s1891_s6, %s1892_s12  }
 0x5fa   :  { %v1409_v20 = vpop.f32.mrb[4].mxu1 }
 0x5fb   :  { %v1410_v43 = vadd.f32 %v1481_v2, %v1409_v20  ;;  %v1683_v35 = vpop.f32.mrb[5].mxu1 }
 0x5fc   :  { %v1412_v24 = vpop.f32.mrb[6].mxu1 }
 0x5fd   :  { %1416 = vst [vmem:[%s2735_s9] sm:$0xff] %v1410_v43  ;;  %v1413_v63 = vadd.f32 %v1481_v2, %v1412_v24  ;;  %v1684_v40 = vpop.f32.mrb[7].mxu1 }
 0x5ff   :  { %1417 = vst [vmem:[%s2735_s9 + $0x8] sm:$0xff] %v1413_v63 }
 0x600   :  { %1885 = dma.done.wait [#allocation3], 256  }
 0x601   :  { %1886 = vsyncadd [#allocation3], 4294967040 }
 0x602   :  { %1437 = vsyncpa [#allocation3], 1 }

</bundles_post_ra>
